<compile_context>
chip_gen: v7x
topology: tpu7x:2x2x1
jax: 0.10.0
libtpu: 0.0.40
codegen_flags: <defaults>
</compile_context>

<pallas_src>
import functools

import jax
import jax.numpy as jnp
from jax import lax
from jax.experimental import pallas as pl
from jax.experimental.pallas import tpu as pltpu

HV_DIM = 64
HE_DIM = 16


def _vmem_spec():
    # Whole array resident in VMEM, single-buffered (no grid -> no pipelining machinery).
    return pl.BlockSpec(memory_space=pltpu.MemorySpace.VMEM)


# --------------------------------------------------------------------------- #
# Fused kernel: encode + PQ encoder + Hamiltonian integration (feature-major)
# --------------------------------------------------------------------------- #
def _hamilton_kernel(atom_t_ref, bond_t_ref, mass_row_ref, cnt_inv_ref,
                     mvw_ref, mvw_t_ref, vew1_ref, vew1_t_ref, vew2_ref,
                     b_ref, b_t_ref,
                     wv_t_ref, bv_col_ref, we_t_ref, be_col_ref,
                     w_hvh_t_ref, b_hvh_col_ref, wenc_v_t_ref,
                     w_heh_t_ref, b_heh_col_ref, wq_t_ref, bq_col_ref,
                     pq_ref, scal_ref,
                     *, layers, tau, dissipate, pq_dim):
    f32 = jnp.float32
    bf16 = jnp.bfloat16

    # ---- atom / bond encoders (feature-major): hv_T [64, A], he_T [16, Bo]
    hv_t = jnp.tanh(jnp.dot(wv_t_ref[...], atom_t_ref[...], preferred_element_type=f32)
                    + bv_col_ref[...])
    he_t = jnp.tanh(jnp.dot(we_t_ref[...], bond_t_ref[...], preferred_element_type=f32)
                    + be_col_ref[...])

    # ---- fused per-atom heads: rows = [ wp (pq_dim) | wd (1) | wenc_u (1) ]
    hv_heads = (jnp.dot(w_hvh_t_ref[...], hv_t, preferred_element_type=f32)
                + b_hvh_col_ref[...])                                   # [pq+2, A]
    p0_t = jnp.tanh(hv_heads[0:pq_dim, :])                              # p0 head     [pq, A]
    gamma_row = jax.nn.sigmoid(hv_heads[pq_dim:pq_dim + 1, :])          # dissipation [1, A]
    proj_u_row = hv_heads[pq_dim + 1:pq_dim + 2, :]                     # enc u-part  [1, A]

    # ---- fused per-bond heads: rows = [ wenc_e (+benc) | wk (+bk) ]
    he_heads = (jnp.dot(w_heh_t_ref[...], he_t, preferred_element_type=f32)
                + b_heh_col_ref[...])                                   # [2, Bo]

    # v_ftr_T = (vew2ᵀ hv)ᵀ = hv_T @ vew2   [64, Bo]  (reused for e_encoder AND q message)
    v_ftr_t = jnp.dot(hv_t.astype(bf16), vew2_ref[...], preferred_element_type=f32)

    # e_encoder logits = vew1ᵀ(hv wenc_u) + (vew2ᵀ hv) wenc_v + (he wenc_e + benc)
    logits_row = (jnp.dot(proj_u_row.astype(bf16), vew1_ref[...], preferred_element_type=f32)
                  + jnp.dot(wenc_v_t_ref[...], v_ftr_t, preferred_element_type=f32)
                  + he_heads[0:1, :])
    e_w_row = jax.nn.sigmoid(logits_row)                                # edge weight [1, Bo]
    k_row = jax.nn.softplus(he_heads[1:2, :])                           # stiffness   [1, Bo]

    # ---- LstmPQEncoder (LSTM=False path): q message = e @ hv WITHOUT materializing e:
    #      (e @ hv)ᵀ = ((e_w ⊙ (vew2ᵀ hv))ᵀ) @ vew1ᵀ
    # TODO(synk): the per-molecule LSTM packing path of LstmPQEncoder is not in the provided
    # source; the non-LSTM linear path with per-molecule mass-center removal is used instead.
    q_msg_t = jnp.dot((v_ftr_t * e_w_row).astype(bf16), vew1_t_ref[...],
                      preferred_element_type=f32)                       # [64, A]
    q_raw_t = jnp.tanh(jnp.dot(wq_t_ref[...], q_msg_t, preferred_element_type=f32)
                       + bq_col_ref[...])                               # [pq, A]
    mol_mean_t = (jnp.dot(q_raw_t.astype(bf16), mvw_t_ref[...], preferred_element_type=f32)
                  * cnt_inv_ref[...])                                   # [pq, M]
    q0_t = q_raw_t - jnp.dot(mol_mean_t.astype(bf16), mvw_ref[...],
                             preferred_element_type=f32)                # [pq, A]

    # ---- DissipativeHamiltonianDerivation (analytic stand-in)
    # TODO(synk): the original module autograds a learned Hamiltonian MLP; here an analytic
    # spring Hamiltonian + Rayleigh dissipation (parameters from hv/he) gives closed-form
    # dH/dp, dH/dq, dD/d(dq). Dropout is ignored (eval mode).
    inv_mass_row = f32(1.0) / jnp.maximum(mass_row_ref[...], f32(1e-6))   # clamped, hoisted

    zero11 = jnp.zeros((1, 1), f32)
    carry0 = (p0_t, q0_t, p0_t, q0_t, zero11, zero11, zero11, zero11)

    def step(_, carry):
        p_t, q_t, p_acc, q_acc, s_loss, c_loss, _, _ = carry

        dq_t = p_t * inv_mass_row                                          # dH/dp   [pq, A]
        diff_t = jnp.dot(q_t.astype(bf16), b_ref[...],
                         preferred_element_type=f32)                       # per-bond disp [pq, Bo]
        grad_t = jnp.dot((k_row * diff_t).astype(bf16), b_t_ref[...],
                         preferred_element_type=f32)                       # dH/dq   [pq, A]
        dp_t = -grad_t
        if dissipate:
            dp_t = dp_t - gamma_row * dq_t                                 # - dD/d(dq)

        # energies (the PyTorch module computes them every step and returns the last)
        kinetic_row = 0.5 * jnp.sum(p_t * p_t, axis=0, keepdims=True) * inv_mass_row   # [1, A]
        spring_row = 0.5 * k_row * jnp.sum(diff_t * diff_t, axis=0, keepdims=True)     # [1, Bo]
        h_e = (jnp.sum(kinetic_row, axis=1, keepdims=True)
               + jnp.sum(spring_row, axis=1, keepdims=True))               # (1, 1)
        d_e = jnp.sum(gamma_row * kinetic_row, axis=1, keepdims=True)      # (1, 1)

        p_new = p_t + tau * dp_t
        q_new = q_t + tau * dq_t

        s_sq = jnp.sum((dq_t - p_t) * (dq_t - p_t), axis=0, keepdims=True)
        s_loss = s_loss + jnp.sqrt(jnp.sum(s_sq, axis=1, keepdims=True))   # (dq - ps[i]).norm()
        delta_t = jnp.dot((p_new - p_t).astype(bf16), mvw_t_ref[...],
                          preferred_element_type=f32)                      # [pq, M]
        c_sq = jnp.sum(delta_t * delta_t, axis=0, keepdims=True)
        c_loss = c_loss + jnp.sqrt(jnp.sum(c_sq, axis=1, keepdims=True))   # (mvw @ dP).norm()

        if not dissipate:
            p_acc = p_acc + p_new
            q_acc = q_acc + q_new
        return (p_new, q_new, p_acc, q_acc, s_loss, c_loss, h_e, d_e)

    (p_t, q_t, p_acc, q_acc, s_loss, c_loss, h_e, d_e) = lax.fori_loop(
        0, layers, step, carry0, unroll=True if layers <= 4 else None)

    if dissipate:
        final_p, final_q = p_t, q_t
    else:
        final_p = p_acc / f32(layers + 1)
        final_q = q_acc / f32(layers + 1)

    # Lane-dense output slab [2*pq, A]; scalars packed into one tiny (1, 4) block.
    pq_ref[0:pq_dim, :] = final_p
    pq_ref[pq_dim:2 * pq_dim, :] = final_q
    scal_ref[...] = jnp.concatenate([s_loss, c_loss, h_e, d_e], axis=1)


# --------------------------------------------------------------------------- #
# Wrapper
# --------------------------------------------------------------------------- #
def hamilton_engine_forward(atom_ftr, bond_ftr, massive, mvw, vew1, vew2, params, config):
    n_atoms = atom_ftr.shape[0]
    pq_dim = int(config["PQ_DIM"])
    layers = int(config["HGN_LAYERS"])
    tau = float(config["TAU"])
    dissipate = bool(config["DISSIPATE"])
    f32, bf16 = jnp.float32, jnp.bfloat16

    # Feature-major inputs (free XLA-side transposes, keeps the kernel lane-dense).
    atom_t = atom_ftr.astype(f32).T                          # [atom_dim, A]
    bond_t = bond_ftr.astype(f32).T                          # [bond_dim, Bo]
    mass_row = massive.astype(f32).reshape(1, n_atoms)       # [1, A]

    # 0/+-1 structure matrices -> bf16 (exact): half HBM traffic & VMEM, native-MXU matmuls.
    vew1_f = vew1.astype(f32)
    vew2_f = vew2.astype(f32)
    mvw_f = mvw.astype(f32)
    b_f = vew1_f - vew2_f                                    # signed incidence matrix B
    vew1_b = vew1_f.astype(bf16)
    vew1_t_b = vew1_f.T.astype(bf16)
    vew2_b = vew2_f.astype(bf16)
    b_b = b_f.astype(bf16)
    b_t_b = b_f.T.astype(bf16)
    mvw_b = mvw_f.astype(bf16)
    mvw_t_b = mvw_f.T.astype(bf16)
    # per-molecule 1/count (clamped), precomputed in f32
    cnt_inv = (1.0 / jnp.maximum(jnp.sum(mvw_f, axis=1, keepdims=True), 1.0)).reshape(1, -1)

    # Split e_encoder weight into [u | he | v] blocks; fuse N=1 heads sharing an operand.
    wenc = params["wenc"]
    wenc_u_t = wenc[0:HV_DIM, :].T                           # [1, 64]
    wenc_e_t = wenc[HV_DIM:HV_DIM + HE_DIM, :].T             # [1, 16]
    wenc_v_t = wenc[HV_DIM + HE_DIM:, :].T                   # [1, 64]  (applied to v_ftr)
    w_hvh_t = jnp.concatenate([params["wp"].T, params["wd"].T, wenc_u_t], axis=0)  # [pq+2, 64]
    b_hvh_col = jnp.concatenate([params["bp"].T, params["bd"].T,
                                 jnp.zeros((1, 1), f32)], axis=0)                  # [pq+2, 1]
    w_heh_t = jnp.concatenate([wenc_e_t, params["wk"].T], axis=0)                  # [2, 16]
    b_heh_col = jnp.concatenate([params["benc"].T, params["bk"].T], axis=0)        # [2, 1]

    inputs = (atom_t, bond_t, mass_row, cnt_inv,
              mvw_b, mvw_t_b, vew1_b, vew1_t_b, vew2_b, b_b, b_t_b,
              params["wv"].T, params["bv"].T, params["we"].T, params["be"].T,
              w_hvh_t, b_hvh_col, wenc_v_t, w_heh_t, b_heh_col,
              params["wq"].T, params["bq"].T)

    kern = functools.partial(_hamilton_kernel, layers=layers, tau=tau,
                             dissipate=dissipate, pq_dim=pq_dim)

    pq_t, scal = pl.pallas_call(
        kern,
        out_shape=(jax.ShapeDtypeStruct((2 * pq_dim, n_atoms), f32),
                   jax.ShapeDtypeStruct((1, 4), f32)),
        in_specs=[_vmem_spec() for _ in inputs],
        out_specs=(_vmem_spec(), _vmem_spec()),
        # 56 MiB is safe on every chip (v7x has 64 MiB physical); raise to ~100 MiB on v5e/v6e
        # for larger graphs.
        compiler_params=pltpu.CompilerParams(vmem_limit_bytes=56 * 1024 * 1024),
    )(*inputs)

    final_p = pq_t[:pq_dim, :].T
    final_q = pq_t[pq_dim:, :].T
    return final_p, final_q, scal[0, 0], scal[0, 1], scal[0, 2], scal[0, 3]


def init_params(key, atom_dim, bond_dim, pq_dim):
    ks = jax.random.split(key, 16)

    def w(k, shape, fan_in):
        return jax.random.normal(k, shape, jnp.float32) / jnp.sqrt(jnp.float32(fan_in))

    return {
        "wv": w(ks[0], (atom_dim, HV_DIM), atom_dim), "bv": jnp.zeros((1, HV_DIM), jnp.float32),
        "we": w(ks[1], (bond_dim, HE_DIM), bond_dim), "be": jnp.zeros((1, HE_DIM), jnp.float32),
        "wenc": w(ks[2], (2 * HV_DIM + HE_DIM, 1), 2 * HV_DIM + HE_DIM),
        "benc": jnp.zeros((1, 1), jnp.float32),
        "wp": w(ks[3], (HV_DIM, pq_dim), HV_DIM), "bp": jnp.zeros((1, pq_dim), jnp.float32),
        "wq": w(ks[4], (HV_DIM, pq_dim), HV_DIM), "bq": jnp.zeros((1, pq_dim), jnp.float32),
        "wk": w(ks[5], (HE_DIM, 1), HE_DIM), "bk": jnp.zeros((1, 1), jnp.float32),
        "wd": w(ks[6], (HV_DIM, 1), HV_DIM), "bd": jnp.zeros((1, 1), jnp.float32),
    }


if __name__ == "__main__":
    config = {"PQ_DIM": 8, "HGN_LAYERS": 3, "TAU": 0.25,
              "DROPOUT": 0.0, "DISSIPATE": True, "LSTM": False}
    atom_dim, bond_dim = 16, 8
    n_mols, n_atoms, n_bonds = 2, 8, 8

    key = jax.random.PRNGKey(0)
    k_atom, k_bond, k_mass, k_param = jax.random.split(key, 4)

    atom_ftr = jax.random.normal(k_atom, (n_atoms, atom_dim), jnp.float32)
    bond_ftr = jax.random.normal(k_bond, (n_bonds, bond_dim), jnp.float32)
    massive = 1.0 + jax.random.uniform(k_mass, (n_atoms, 1), jnp.float32)

    # two molecules of 4 atoms each, 4 ring bonds per molecule
    mvw = jnp.array([[1, 1, 1, 1, 0, 0, 0, 0],
                     [0, 0, 0, 0, 1, 1, 1, 1]], jnp.float32)
    src = [0, 1, 2, 3, 4, 5, 6, 7]
    dst = [1, 2, 3, 0, 5, 6, 7, 4]
    vew1 = jnp.zeros((n_atoms, n_bonds), jnp.float32).at[jnp.array(src), jnp.arange(n_bonds)].set(1.0)
    vew2 = jnp.zeros((n_atoms, n_bonds), jnp.float32).at[jnp.array(dst), jnp.arange(n_bonds)].set(1.0)

    params = init_params(k_param, atom_dim, bond_dim, config["PQ_DIM"])

    outs = hamilton_engine_forward(atom_ftr, bond_ftr, massive, mvw, vew1, vew2, params, config)
    outs = jax.block_until_ready(outs)
    final_p, final_q, s_loss, c_loss, h, d = outs
    assert final_p.shape == (n_atoms, config["PQ_DIM"])
    assert final_q.shape == (n_atoms, config["PQ_DIM"])
    assert all(bool(jnp.isfinite(x).all()) for x in outs)
    print("KERNEL_OK")
</pallas_src>

<mosaic_0001>
module attributes {stable_mosaic.version = 11 : i64} {
  func.func @_hamilton_kernel(%arg0: memref<16x8xf32, #tpu.memory_space<vmem>>, %arg1: memref<8x8xf32, #tpu.memory_space<vmem>>, %arg2: memref<1x8xf32, #tpu.memory_space<vmem>>, %arg3: memref<1x2xf32, #tpu.memory_space<vmem>>, %arg4: memref<2x8xbf16, #tpu.memory_space<vmem>>, %arg5: memref<8x2xbf16, #tpu.memory_space<vmem>>, %arg6: memref<8x8xbf16, #tpu.memory_space<vmem>>, %arg7: memref<8x8xbf16, #tpu.memory_space<vmem>>, %arg8: memref<8x8xbf16, #tpu.memory_space<vmem>>, %arg9: memref<8x8xbf16, #tpu.memory_space<vmem>>, %arg10: memref<8x8xbf16, #tpu.memory_space<vmem>>, %arg11: memref<64x16xf32, #tpu.memory_space<vmem>>, %arg12: memref<64x1xf32, #tpu.memory_space<vmem>>, %arg13: memref<16x8xf32, #tpu.memory_space<vmem>>, %arg14: memref<16x1xf32, #tpu.memory_space<vmem>>, %arg15: memref<10x64xf32, #tpu.memory_space<vmem>>, %arg16: memref<10x1xf32, #tpu.memory_space<vmem>>, %arg17: memref<1x64xf32, #tpu.memory_space<vmem>>, %arg18: memref<2x16xf32, #tpu.memory_space<vmem>>, %arg19: memref<2x1xf32, #tpu.memory_space<vmem>>, %arg20: memref<8x64xf32, #tpu.memory_space<vmem>>, %arg21: memref<8x1xf32, #tpu.memory_space<vmem>>, %arg22: memref<16x8xf32, #tpu.memory_space<vmem>>, %arg23: memref<1x4xf32, #tpu.memory_space<vmem>>) attributes {dimension_semantics = [], scalar_prefetch = 0 : i64, scratch_operands = 0 : i64, tpu.core_type = #tpu.core_type<tc>} {
    %c0 = arith.constant 0 : index
    %c0_0 = arith.constant 0 : index
    %0 = vector.load %arg11[%c0, %c0_0] : memref<64x16xf32, #tpu.memory_space<vmem>>, vector<64x16xf32>
    %c0_1 = arith.constant 0 : index
    %c0_2 = arith.constant 0 : index
    %1 = vector.load %arg0[%c0_1, %c0_2] : memref<16x8xf32, #tpu.memory_space<vmem>>, vector<16x8xf32>
    %cst = arith.constant dense<0.000000e+00> : vector<64x8xf32>
    %2 = tpu.matmul %0, %1, %cst {dimension_numbers = #tpu.dot_dimension_numbers<[1], [0], [0], [1], [0, 0, 1, 1], [], []>} : vector<64x16xf32>, vector<16x8xf32>, vector<64x8xf32> -> vector<64x8xf32>
    %c0_3 = arith.constant 0 : index
    %c0_4 = arith.constant 0 : index
    %3 = vector.load %arg12[%c0_3, %c0_4] : memref<64x1xf32, #tpu.memory_space<vmem>>, vector<64x1xf32>
    %4 = vector.broadcast %3 : vector<64x1xf32> to vector<64x8xf32>
    %5 = arith.addf %2, %4 : vector<64x8xf32>
    %6 = math.tanh %5 : vector<64x8xf32>
    %c0_5 = arith.constant 0 : index
    %c0_6 = arith.constant 0 : index
    %7 = vector.load %arg13[%c0_5, %c0_6] : memref<16x8xf32, #tpu.memory_space<vmem>>, vector<16x8xf32>
    %c0_7 = arith.constant 0 : index
    %c0_8 = arith.constant 0 : index
    %8 = vector.load %arg1[%c0_7, %c0_8] : memref<8x8xf32, #tpu.memory_space<vmem>>, vector<8x8xf32>
    %cst_9 = arith.constant dense<0.000000e+00> : vector<16x8xf32>
    %9 = tpu.matmul %7, %8, %cst_9 {dimension_numbers = #tpu.dot_dimension_numbers<[1], [0], [0], [1], [0, 0, 1, 1], [], []>} : vector<16x8xf32>, vector<8x8xf32>, vector<16x8xf32> -> vector<16x8xf32>
    %c0_10 = arith.constant 0 : index
    %c0_11 = arith.constant 0 : index
    %10 = vector.load %arg14[%c0_10, %c0_11] : memref<16x1xf32, #tpu.memory_space<vmem>>, vector<16x1xf32>
    %11 = vector.broadcast %10 : vector<16x1xf32> to vector<16x8xf32>
    %12 = arith.addf %9, %11 : vector<16x8xf32>
    %13 = math.tanh %12 : vector<16x8xf32>
    %c0_12 = arith.constant 0 : index
    %c0_13 = arith.constant 0 : index
    %14 = vector.load %arg15[%c0_12, %c0_13] : memref<10x64xf32, #tpu.memory_space<vmem>>, vector<10x64xf32>
    %cst_14 = arith.constant dense<0.000000e+00> : vector<10x8xf32>
    %15 = tpu.matmul %14, %6, %cst_14 {dimension_numbers = #tpu.dot_dimension_numbers<[1], [0], [0], [1], [0, 0, 1, 1], [], []>} : vector<10x64xf32>, vector<64x8xf32>, vector<10x8xf32> -> vector<10x8xf32>
    %c0_15 = arith.constant 0 : index
    %c0_16 = arith.constant 0 : index
    %16 = vector.load %arg16[%c0_15, %c0_16] : memref<10x1xf32, #tpu.memory_space<vmem>>, vector<10x1xf32>
    %17 = vector.broadcast %16 : vector<10x1xf32> to vector<10x8xf32>
    %18 = arith.addf %15, %17 : vector<10x8xf32>
    %19 = vector.extract_strided_slice %18 {offsets = [0, 0], sizes = [8, 8], strides = [1, 1]} : vector<10x8xf32> to vector<8x8xf32>
    %20 = math.tanh %19 : vector<8x8xf32>
    %21 = vector.extract_strided_slice %18 {offsets = [8, 0], sizes = [1, 8], strides = [1, 1]} : vector<10x8xf32> to vector<1x8xf32>
    %22 = arith.negf %21 : vector<1x8xf32>
    %23 = math.exp %22 : vector<1x8xf32>
    %cst_17 = arith.constant 1.000000e+00 : f32
    %24 = vector.broadcast %cst_17 : f32 to vector<1x8xf32>
    %25 = arith.addf %24, %23 : vector<1x8xf32>
    %26 = arith.divf %24, %25 : vector<1x8xf32>
    %27 = vector.extract_strided_slice %18 {offsets = [9, 0], sizes = [1, 8], strides = [1, 1]} : vector<10x8xf32> to vector<1x8xf32>
    %c0_18 = arith.constant 0 : index
    %c0_19 = arith.constant 0 : index
    %28 = vector.load %arg18[%c0_18, %c0_19] : memref<2x16xf32, #tpu.memory_space<vmem>>, vector<2x16xf32>
    %cst_20 = arith.constant dense<0.000000e+00> : vector<2x8xf32>
    %29 = tpu.matmul %28, %13, %cst_20 {dimension_numbers = #tpu.dot_dimension_numbers<[1], [0], [0], [1], [0, 0, 1, 1], [], []>} : vector<2x16xf32>, vector<16x8xf32>, vector<2x8xf32> -> vector<2x8xf32>
    %c0_21 = arith.constant 0 : index
    %c0_22 = arith.constant 0 : index
    %30 = vector.load %arg19[%c0_21, %c0_22] : memref<2x1xf32, #tpu.memory_space<vmem>>, vector<2x1xf32>
    %31 = vector.broadcast %30 : vector<2x1xf32> to vector<2x8xf32>
    %32 = arith.addf %29, %31 : vector<2x8xf32>
    %33 = arith.truncf %6 : vector<64x8xf32> to vector<64x8xbf16>
    %c0_23 = arith.constant 0 : index
    %c0_24 = arith.constant 0 : index
    %34 = vector.load %arg8[%c0_23, %c0_24] : memref<8x8xbf16, #tpu.memory_space<vmem>>, vector<8x8xbf16>
    %cst_25 = arith.constant dense<0.000000e+00> : vector<64x8xf32>
    %35 = tpu.matmul %33, %34, %cst_25 {dimension_numbers = #tpu.dot_dimension_numbers<[1], [0], [0], [1], [0, 0, 1, 1], [], []>} : vector<64x8xbf16>, vector<8x8xbf16>, vector<64x8xf32> -> vector<64x8xf32>
    %36 = arith.truncf %27 : vector<1x8xf32> to vector<1x8xbf16>
    %c0_26 = arith.constant 0 : index
    %c0_27 = arith.constant 0 : index
    %37 = vector.load %arg6[%c0_26, %c0_27] : memref<8x8xbf16, #tpu.memory_space<vmem>>, vector<8x8xbf16>
    %cst_28 = arith.constant dense<0.000000e+00> : vector<1x8xf32>
    %38 = tpu.matmul %36, %37, %cst_28 {dimension_numbers = #tpu.dot_dimension_numbers<[1], [0], [0], [1], [0, 0, 1, 1], [], []>} : vector<1x8xbf16>, vector<8x8xbf16>, vector<1x8xf32> -> vector<1x8xf32>
    %c0_29 = arith.constant 0 : index
    %c0_30 = arith.constant 0 : index
    %39 = vector.load %arg17[%c0_29, %c0_30] : memref<1x64xf32, #tpu.memory_space<vmem>>, vector<1x64xf32>
    %cst_31 = arith.constant dense<0.000000e+00> : vector<1x8xf32>
    %40 = tpu.matmul %39, %35, %cst_31 {dimension_numbers = #tpu.dot_dimension_numbers<[1], [0], [0], [1], [0, 0, 1, 1], [], []>} : vector<1x64xf32>, vector<64x8xf32>, vector<1x8xf32> -> vector<1x8xf32>
    %41 = arith.addf %38, %40 : vector<1x8xf32>
    %42 = vector.extract_strided_slice %32 {offsets = [0, 0], sizes = [1, 8], strides = [1, 1]} : vector<2x8xf32> to vector<1x8xf32>
    %43 = arith.addf %41, %42 : vector<1x8xf32>
    %44 = arith.negf %43 : vector<1x8xf32>
    %45 = math.exp %44 : vector<1x8xf32>
    %cst_32 = arith.constant 1.000000e+00 : f32
    %46 = vector.broadcast %cst_32 : f32 to vector<1x8xf32>
    %47 = arith.addf %46, %45 : vector<1x8xf32>
    %48 = arith.divf %46, %47 : vector<1x8xf32>
    %49 = vector.extract_strided_slice %32 {offsets = [1, 0], sizes = [1, 8], strides = [1, 1]} : vector<2x8xf32> to vector<1x8xf32>
    %cst_33 = arith.constant 0.000000e+00 : f32
    %50 = vector.broadcast %cst_33 : f32 to vector<1x8xf32>
    %51 = arith.maximumf %49, %50 : vector<1x8xf32>
    %52 = vector.broadcast %cst_33 : f32 to vector<1x8xf32>
    %53 = arith.subf %49, %52 : vector<1x8xf32>
    %54 = arith.cmpf one, %53, %53 : vector<1x8xf32>
    %55 = vector.broadcast %cst_33 : f32 to vector<1x8xf32>
    %56 = arith.addf %49, %55 : vector<1x8xf32>
    %57 = math.absf %53 : vector<1x8xf32>
    %cst_34 = arith.constant 0.000000e+00 : f32
    %58 = vector.broadcast %cst_34 : f32 to vector<1x8xf32>
    %59 = arith.subf %58, %57 : vector<1x8xf32>
    %60 = math.exp %59 : vector<1x8xf32>
    %61 = math.log1p %60 : vector<1x8xf32>
    %62 = arith.addf %51, %61 : vector<1x8xf32>
    %63 = arith.select %54, %56, %62 : vector<1x8xi1>, vector<1x8xf32>
    %64 = vector.broadcast %48 : vector<1x8xf32> to vector<64x8xf32>
    %65 = arith.mulf %35, %64 : vector<64x8xf32>
    %66 = arith.truncf %65 : vector<64x8xf32> to vector<64x8xbf16>
    %c0_35 = arith.constant 0 : index
    %c0_36 = arith.constant 0 : index
    %67 = vector.load %arg7[%c0_35, %c0_36] : memref<8x8xbf16, #tpu.memory_space<vmem>>, vector<8x8xbf16>
    %cst_37 = arith.constant dense<0.000000e+00> : vector<64x8xf32>
    %68 = tpu.matmul %66, %67, %cst_37 {dimension_numbers = #tpu.dot_dimension_numbers<[1], [0], [0], [1], [0, 0, 1, 1], [], []>} : vector<64x8xbf16>, vector<8x8xbf16>, vector<64x8xf32> -> vector<64x8xf32>
    %c0_38 = arith.constant 0 : index
    %c0_39 = arith.constant 0 : index
    %69 = vector.load %arg20[%c0_38, %c0_39] : memref<8x64xf32, #tpu.memory_space<vmem>>, vector<8x64xf32>
    %cst_40 = arith.constant dense<0.000000e+00> : vector<8x8xf32>
    %70 = tpu.matmul %69, %68, %cst_40 {dimension_numbers = #tpu.dot_dimension_numbers<[1], [0], [0], [1], [0, 0, 1, 1], [], []>} : vector<8x64xf32>, vector<64x8xf32>, vector<8x8xf32> -> vector<8x8xf32>
    %c0_41 = arith.constant 0 : index
    %c0_42 = arith.constant 0 : index
    %71 = vector.load %arg21[%c0_41, %c0_42] : memref<8x1xf32, #tpu.memory_space<vmem>>, vector<8x1xf32>
    %72 = vector.broadcast %71 : vector<8x1xf32> to vector<8x8xf32>
    %73 = arith.addf %70, %72 : vector<8x8xf32>
    %74 = math.tanh %73 : vector<8x8xf32>
    %75 = arith.truncf %74 : vector<8x8xf32> to vector<8x8xbf16>
    %c0_43 = arith.constant 0 : index
    %c0_44 = arith.constant 0 : index
    %76 = vector.load %arg5[%c0_43, %c0_44] : memref<8x2xbf16, #tpu.memory_space<vmem>>, vector<8x2xbf16>
    %cst_45 = arith.constant dense<0.000000e+00> : vector<8x2xf32>
    %77 = tpu.matmul %75, %76, %cst_45 {dimension_numbers = #tpu.dot_dimension_numbers<[1], [0], [0], [1], [0, 0, 1, 1], [], []>} : vector<8x8xbf16>, vector<8x2xbf16>, vector<8x2xf32> -> vector<8x2xf32>
    %c0_46 = arith.constant 0 : index
    %c0_47 = arith.constant 0 : index
    %78 = vector.load %arg3[%c0_46, %c0_47] : memref<1x2xf32, #tpu.memory_space<vmem>>, vector<1x2xf32>
    %79 = vector.broadcast %78 : vector<1x2xf32> to vector<8x2xf32>
    %80 = arith.mulf %77, %79 : vector<8x2xf32>
    %81 = arith.truncf %80 : vector<8x2xf32> to vector<8x2xbf16>
    %c0_48 = arith.constant 0 : index
    %c0_49 = arith.constant 0 : index
    %82 = vector.load %arg4[%c0_48, %c0_49] : memref<2x8xbf16, #tpu.memory_space<vmem>>, vector<2x8xbf16>
    %cst_50 = arith.constant dense<0.000000e+00> : vector<8x8xf32>
    %83 = tpu.matmul %81, %82, %cst_50 {dimension_numbers = #tpu.dot_dimension_numbers<[1], [0], [0], [1], [0, 0, 1, 1], [], []>} : vector<8x2xbf16>, vector<2x8xbf16>, vector<8x8xf32> -> vector<8x8xf32>
    %84 = arith.subf %74, %83 : vector<8x8xf32>
    %c0_51 = arith.constant 0 : index
    %c0_52 = arith.constant 0 : index
    %85 = vector.load %arg2[%c0_51, %c0_52] : memref<1x8xf32, #tpu.memory_space<vmem>>, vector<1x8xf32>
    %cst_53 = arith.constant 9.99999997E-7 : f32
    %86 = vector.broadcast %cst_53 : f32 to vector<1x8xf32>
    %87 = arith.maximumf %85, %86 : vector<1x8xf32>
    %cst_54 = arith.constant 1.000000e+00 : f32
    %88 = vector.broadcast %cst_54 : f32 to vector<1x8xf32>
    %89 = arith.divf %88, %87 : vector<1x8xf32>
    %cst_55 = arith.constant 0.000000e+00 : f32
    %90 = vector.broadcast %cst_55 : f32 to vector<1x1xf32>
    %c0_i32 = arith.constant 0 : i32
    %91 = vector.broadcast %89 : vector<1x8xf32> to vector<8x8xf32>
    %92 = arith.mulf %20, %91 : vector<8x8xf32>
    %93 = arith.truncf %84 : vector<8x8xf32> to vector<8x8xbf16>
    %c0_56 = arith.constant 0 : index
    %c0_57 = arith.constant 0 : index
    %94 = vector.load %arg9[%c0_56, %c0_57] : memref<8x8xbf16, #tpu.memory_space<vmem>>, vector<8x8xbf16>
    %cst_58 = arith.constant dense<0.000000e+00> : vector<8x8xf32>
    %95 = tpu.matmul %93, %94, %cst_58 {dimension_numbers = #tpu.dot_dimension_numbers<[1], [0], [0], [1], [0, 0, 1, 1], [], []>} : vector<8x8xbf16>, vector<8x8xbf16>, vector<8x8xf32> -> vector<8x8xf32>
    %96 = vector.broadcast %63 : vector<1x8xf32> to vector<8x8xf32>
    %97 = arith.mulf %96, %95 : vector<8x8xf32>
    %98 = arith.truncf %97 : vector<8x8xf32> to vector<8x8xbf16>
    %c0_59 = arith.constant 0 : index
    %c0_60 = arith.constant 0 : index
    %99 = vector.load %arg10[%c0_59, %c0_60] : memref<8x8xbf16, #tpu.memory_space<vmem>>, vector<8x8xbf16>
    %cst_61 = arith.constant dense<0.000000e+00> : vector<8x8xf32>
    %100 = tpu.matmul %98, %99, %cst_61 {dimension_numbers = #tpu.dot_dimension_numbers<[1], [0], [0], [1], [0, 0, 1, 1], [], []>} : vector<8x8xbf16>, vector<8x8xbf16>, vector<8x8xf32> -> vector<8x8xf32>
    %cst_62 = arith.constant 0.000000e+00 : f32
    %101 = vector.broadcast %cst_62 : f32 to vector<8x8xf32>
    %102 = arith.subf %101, %100 : vector<8x8xf32>
    %103 = vector.broadcast %26 : vector<1x8xf32> to vector<8x8xf32>
    %104 = arith.mulf %103, %92 : vector<8x8xf32>
    %105 = arith.subf %102, %104 : vector<8x8xf32>
    %106 = arith.mulf %20, %20 : vector<8x8xf32>
    %cst_63 = arith.constant dense<0.000000e+00> : vector<8xf32>
    %107 = vector.multi_reduction <add>, %106, %cst_63 [0] : vector<8x8xf32> to vector<8xf32>
    %108 = vector.shape_cast %107 : vector<8xf32> to vector<1x8xf32>
    %cst_64 = arith.constant 5.000000e-01 : f32
    %109 = vector.broadcast %cst_64 : f32 to vector<1x8xf32>
    %110 = arith.mulf %109, %108 : vector<1x8xf32>
    %111 = arith.mulf %110, %89 : vector<1x8xf32>
    %cst_65 = arith.constant 5.000000e-01 : f32
    %112 = vector.broadcast %cst_65 : f32 to vector<1x8xf32>
    %113 = arith.mulf %112, %63 : vector<1x8xf32>
    %114 = arith.mulf %95, %95 : vector<8x8xf32>
    %cst_66 = arith.constant dense<0.000000e+00> : vector<8xf32>
    %115 = vector.multi_reduction <add>, %114, %cst_66 [0] : vector<8x8xf32> to vector<8xf32>
    %116 = vector.shape_cast %115 : vector<8xf32> to vector<1x8xf32>
    %117 = arith.mulf %113, %116 : vector<1x8xf32>
    %cst_67 = arith.constant dense<0.000000e+00> : vector<1xf32>
    %118 = vector.multi_reduction <add>, %111, %cst_67 [1] : vector<1x8xf32> to vector<1xf32>
    %119 = vector.shape_cast %118 : vector<1xf32> to vector<1x1xf32>
    %cst_68 = arith.constant dense<0.000000e+00> : vector<1xf32>
    %120 = vector.multi_reduction <add>, %117, %cst_68 [1] : vector<1x8xf32> to vector<1xf32>
    %121 = vector.shape_cast %120 : vector<1xf32> to vector<1x1xf32>
    %122 = arith.addf %119, %121 : vector<1x1xf32>
    %123 = arith.mulf %26, %111 : vector<1x8xf32>
    %cst_69 = arith.constant dense<0.000000e+00> : vector<1xf32>
    %124 = vector.multi_reduction <add>, %123, %cst_69 [1] : vector<1x8xf32> to vector<1xf32>
    %125 = vector.shape_cast %124 : vector<1xf32> to vector<1x1xf32>
    %cst_70 = arith.constant 2.500000e-01 : f32
    %126 = vector.broadcast %cst_70 : f32 to vector<8x8xf32>
    %127 = arith.mulf %126, %105 : vector<8x8xf32>
    %128 = arith.addf %20, %127 : vector<8x8xf32>
    %cst_71 = arith.constant 2.500000e-01 : f32
    %129 = vector.broadcast %cst_71 : f32 to vector<8x8xf32>
    %130 = arith.mulf %129, %92 : vector<8x8xf32>
    %131 = arith.addf %84, %130 : vector<8x8xf32>
    %132 = arith.subf %92, %20 : vector<8x8xf32>
    %133 = arith.subf %92, %20 : vector<8x8xf32>
    %134 = arith.mulf %132, %133 : vector<8x8xf32>
    %cst_72 = arith.constant dense<0.000000e+00> : vector<8xf32>
    %135 = vector.multi_reduction <add>, %134, %cst_72 [0] : vector<8x8xf32> to vector<8xf32>
    %136 = vector.shape_cast %135 : vector<8xf32> to vector<1x8xf32>
    %cst_73 = arith.constant dense<0.000000e+00> : vector<1xf32>
    %137 = vector.multi_reduction <add>, %136, %cst_73 [1] : vector<1x8xf32> to vector<1xf32>
    %138 = vector.shape_cast %137 : vector<1xf32> to vector<1x1xf32>
    %139 = math.sqrt %138 : vector<1x1xf32>
    %140 = arith.addf %90, %139 : vector<1x1xf32>
    %141 = arith.subf %128, %20 : vector<8x8xf32>
    %142 = arith.truncf %141 : vector<8x8xf32> to vector<8x8xbf16>
    %c0_74 = arith.constant 0 : index
    %c0_75 = arith.constant 0 : index
    %143 = vector.load %arg5[%c0_74, %c0_75] : memref<8x2xbf16, #tpu.memory_space<vmem>>, vector<8x2xbf16>
    %cst_76 = arith.constant dense<0.000000e+00> : vector<8x2xf32>
    %144 = tpu.matmul %142, %143, %cst_76 {dimension_numbers = #tpu.dot_dimension_numbers<[1], [0], [0], [1], [0, 0, 1, 1], [], []>} : vector<8x8xbf16>, vector<8x2xbf16>, vector<8x2xf32> -> vector<8x2xf32>
    %145 = arith.mulf %144, %144 : vector<8x2xf32>
    %cst_77 = arith.constant dense<0.000000e+00> : vector<2xf32>
    %146 = vector.multi_reduction <add>, %145, %cst_77 [0] : vector<8x2xf32> to vector<2xf32>
    %147 = vector.shape_cast %146 : vector<2xf32> to vector<1x2xf32>
    %cst_78 = arith.constant dense<0.000000e+00> : vector<1xf32>
    %148 = vector.multi_reduction <add>, %147, %cst_78 [1] : vector<1x2xf32> to vector<1xf32>
    %149 = vector.shape_cast %148 : vector<1xf32> to vector<1x1xf32>
    %150 = math.sqrt %149 : vector<1x1xf32>
    %151 = arith.addf %90, %150 : vector<1x1xf32>
    %c1_i32 = arith.constant 1 : i32
    %152 = vector.broadcast %89 : vector<1x8xf32> to vector<8x8xf32>
    %153 = arith.mulf %128, %152 : vector<8x8xf32>
    %154 = arith.truncf %131 : vector<8x8xf32> to vector<8x8xbf16>
    %c0_79 = arith.constant 0 : index
    %c0_80 = arith.constant 0 : index
    %155 = vector.load %arg9[%c0_79, %c0_80] : memref<8x8xbf16, #tpu.memory_space<vmem>>, vector<8x8xbf16>
    %cst_81 = arith.constant dense<0.000000e+00> : vector<8x8xf32>
    %156 = tpu.matmul %154, %155, %cst_81 {dimension_numbers = #tpu.dot_dimension_numbers<[1], [0], [0], [1], [0, 0, 1, 1], [], []>} : vector<8x8xbf16>, vector<8x8xbf16>, vector<8x8xf32> -> vector<8x8xf32>
    %157 = vector.broadcast %63 : vector<1x8xf32> to vector<8x8xf32>
    %158 = arith.mulf %157, %156 : vector<8x8xf32>
    %159 = arith.truncf %158 : vector<8x8xf32> to vector<8x8xbf16>
    %c0_82 = arith.constant 0 : index
    %c0_83 = arith.constant 0 : index
    %160 = vector.load %arg10[%c0_82, %c0_83] : memref<8x8xbf16, #tpu.memory_space<vmem>>, vector<8x8xbf16>
    %cst_84 = arith.constant dense<0.000000e+00> : vector<8x8xf32>
    %161 = tpu.matmul %159, %160, %cst_84 {dimension_numbers = #tpu.dot_dimension_numbers<[1], [0], [0], [1], [0, 0, 1, 1], [], []>} : vector<8x8xbf16>, vector<8x8xbf16>, vector<8x8xf32> -> vector<8x8xf32>
    %cst_85 = arith.constant 0.000000e+00 : f32
    %162 = vector.broadcast %cst_85 : f32 to vector<8x8xf32>
    %163 = arith.subf %162, %161 : vector<8x8xf32>
    %164 = vector.broadcast %26 : vector<1x8xf32> to vector<8x8xf32>
    %165 = arith.mulf %164, %153 : vector<8x8xf32>
    %166 = arith.subf %163, %165 : vector<8x8xf32>
    %167 = arith.mulf %128, %128 : vector<8x8xf32>
    %cst_86 = arith.constant dense<0.000000e+00> : vector<8xf32>
    %168 = vector.multi_reduction <add>, %167, %cst_86 [0] : vector<8x8xf32> to vector<8xf32>
    %169 = vector.shape_cast %168 : vector<8xf32> to vector<1x8xf32>
    %cst_87 = arith.constant 5.000000e-01 : f32
    %170 = vector.broadcast %cst_87 : f32 to vector<1x8xf32>
    %171 = arith.mulf %170, %169 : vector<1x8xf32>
    %172 = arith.mulf %171, %89 : vector<1x8xf32>
    %cst_88 = arith.constant 5.000000e-01 : f32
    %173 = vector.broadcast %cst_88 : f32 to vector<1x8xf32>
    %174 = arith.mulf %173, %63 : vector<1x8xf32>
    %175 = arith.mulf %156, %156 : vector<8x8xf32>
    %cst_89 = arith.constant dense<0.000000e+00> : vector<8xf32>
    %176 = vector.multi_reduction <add>, %175, %cst_89 [0] : vector<8x8xf32> to vector<8xf32>
    %177 = vector.shape_cast %176 : vector<8xf32> to vector<1x8xf32>
    %178 = arith.mulf %174, %177 : vector<1x8xf32>
    %cst_90 = arith.constant dense<0.000000e+00> : vector<1xf32>
    %179 = vector.multi_reduction <add>, %172, %cst_90 [1] : vector<1x8xf32> to vector<1xf32>
    %180 = vector.shape_cast %179 : vector<1xf32> to vector<1x1xf32>
    %cst_91 = arith.constant dense<0.000000e+00> : vector<1xf32>
    %181 = vector.multi_reduction <add>, %178, %cst_91 [1] : vector<1x8xf32> to vector<1xf32>
    %182 = vector.shape_cast %181 : vector<1xf32> to vector<1x1xf32>
    %183 = arith.addf %180, %182 : vector<1x1xf32>
    %184 = arith.mulf %26, %172 : vector<1x8xf32>
    %cst_92 = arith.constant dense<0.000000e+00> : vector<1xf32>
    %185 = vector.multi_reduction <add>, %184, %cst_92 [1] : vector<1x8xf32> to vector<1xf32>
    %186 = vector.shape_cast %185 : vector<1xf32> to vector<1x1xf32>
    %cst_93 = arith.constant 2.500000e-01 : f32
    %187 = vector.broadcast %cst_93 : f32 to vector<8x8xf32>
    %188 = arith.mulf %187, %166 : vector<8x8xf32>
    %189 = arith.addf %128, %188 : vector<8x8xf32>
    %cst_94 = arith.constant 2.500000e-01 : f32
    %190 = vector.broadcast %cst_94 : f32 to vector<8x8xf32>
    %191 = arith.mulf %190, %153 : vector<8x8xf32>
    %192 = arith.addf %131, %191 : vector<8x8xf32>
    %193 = arith.subf %153, %128 : vector<8x8xf32>
    %194 = arith.subf %153, %128 : vector<8x8xf32>
    %195 = arith.mulf %193, %194 : vector<8x8xf32>
    %cst_95 = arith.constant dense<0.000000e+00> : vector<8xf32>
    %196 = vector.multi_reduction <add>, %195, %cst_95 [0] : vector<8x8xf32> to vector<8xf32>
    %197 = vector.shape_cast %196 : vector<8xf32> to vector<1x8xf32>
    %cst_96 = arith.constant dense<0.000000e+00> : vector<1xf32>
    %198 = vector.multi_reduction <add>, %197, %cst_96 [1] : vector<1x8xf32> to vector<1xf32>
    %199 = vector.shape_cast %198 : vector<1xf32> to vector<1x1xf32>
    %200 = math.sqrt %199 : vector<1x1xf32>
    %201 = arith.addf %140, %200 : vector<1x1xf32>
    %202 = arith.subf %189, %128 : vector<8x8xf32>
    %203 = arith.truncf %202 : vector<8x8xf32> to vector<8x8xbf16>
    %c0_97 = arith.constant 0 : index
    %c0_98 = arith.constant 0 : index
    %204 = vector.load %arg5[%c0_97, %c0_98] : memref<8x2xbf16, #tpu.memory_space<vmem>>, vector<8x2xbf16>
    %cst_99 = arith.constant dense<0.000000e+00> : vector<8x2xf32>
    %205 = tpu.matmul %203, %204, %cst_99 {dimension_numbers = #tpu.dot_dimension_numbers<[1], [0], [0], [1], [0, 0, 1, 1], [], []>} : vector<8x8xbf16>, vector<8x2xbf16>, vector<8x2xf32> -> vector<8x2xf32>
    %206 = arith.mulf %205, %205 : vector<8x2xf32>
    %cst_100 = arith.constant dense<0.000000e+00> : vector<2xf32>
    %207 = vector.multi_reduction <add>, %206, %cst_100 [0] : vector<8x2xf32> to vector<2xf32>
    %208 = vector.shape_cast %207 : vector<2xf32> to vector<1x2xf32>
    %cst_101 = arith.constant dense<0.000000e+00> : vector<1xf32>
    %209 = vector.multi_reduction <add>, %208, %cst_101 [1] : vector<1x2xf32> to vector<1xf32>
    %210 = vector.shape_cast %209 : vector<1xf32> to vector<1x1xf32>
    %211 = math.sqrt %210 : vector<1x1xf32>
    %212 = arith.addf %151, %211 : vector<1x1xf32>
    %c2_i32 = arith.constant 2 : i32
    %213 = vector.broadcast %89 : vector<1x8xf32> to vector<8x8xf32>
    %214 = arith.mulf %189, %213 : vector<8x8xf32>
    %215 = arith.truncf %192 : vector<8x8xf32> to vector<8x8xbf16>
    %c0_102 = arith.constant 0 : index
    %c0_103 = arith.constant 0 : index
    %216 = vector.load %arg9[%c0_102, %c0_103] : memref<8x8xbf16, #tpu.memory_space<vmem>>, vector<8x8xbf16>
    %cst_104 = arith.constant dense<0.000000e+00> : vector<8x8xf32>
    %217 = tpu.matmul %215, %216, %cst_104 {dimension_numbers = #tpu.dot_dimension_numbers<[1], [0], [0], [1], [0, 0, 1, 1], [], []>} : vector<8x8xbf16>, vector<8x8xbf16>, vector<8x8xf32> -> vector<8x8xf32>
    %218 = vector.broadcast %63 : vector<1x8xf32> to vector<8x8xf32>
    %219 = arith.mulf %218, %217 : vector<8x8xf32>
    %220 = arith.truncf %219 : vector<8x8xf32> to vector<8x8xbf16>
    %c0_105 = arith.constant 0 : index
    %c0_106 = arith.constant 0 : index
    %221 = vector.load %arg10[%c0_105, %c0_106] : memref<8x8xbf16, #tpu.memory_space<vmem>>, vector<8x8xbf16>
    %cst_107 = arith.constant dense<0.000000e+00> : vector<8x8xf32>
    %222 = tpu.matmul %220, %221, %cst_107 {dimension_numbers = #tpu.dot_dimension_numbers<[1], [0], [0], [1], [0, 0, 1, 1], [], []>} : vector<8x8xbf16>, vector<8x8xbf16>, vector<8x8xf32> -> vector<8x8xf32>
    %cst_108 = arith.constant 0.000000e+00 : f32
    %223 = vector.broadcast %cst_108 : f32 to vector<8x8xf32>
    %224 = arith.subf %223, %222 : vector<8x8xf32>
    %225 = vector.broadcast %26 : vector<1x8xf32> to vector<8x8xf32>
    %226 = arith.mulf %225, %214 : vector<8x8xf32>
    %227 = arith.subf %224, %226 : vector<8x8xf32>
    %228 = arith.mulf %189, %189 : vector<8x8xf32>
    %cst_109 = arith.constant dense<0.000000e+00> : vector<8xf32>
    %229 = vector.multi_reduction <add>, %228, %cst_109 [0] : vector<8x8xf32> to vector<8xf32>
    %230 = vector.shape_cast %229 : vector<8xf32> to vector<1x8xf32>
    %cst_110 = arith.constant 5.000000e-01 : f32
    %231 = vector.broadcast %cst_110 : f32 to vector<1x8xf32>
    %232 = arith.mulf %231, %230 : vector<1x8xf32>
    %233 = arith.mulf %232, %89 : vector<1x8xf32>
    %cst_111 = arith.constant 5.000000e-01 : f32
    %234 = vector.broadcast %cst_111 : f32 to vector<1x8xf32>
    %235 = arith.mulf %234, %63 : vector<1x8xf32>
    %236 = arith.mulf %217, %217 : vector<8x8xf32>
    %cst_112 = arith.constant dense<0.000000e+00> : vector<8xf32>
    %237 = vector.multi_reduction <add>, %236, %cst_112 [0] : vector<8x8xf32> to vector<8xf32>
    %238 = vector.shape_cast %237 : vector<8xf32> to vector<1x8xf32>
    %239 = arith.mulf %235, %238 : vector<1x8xf32>
    %cst_113 = arith.constant dense<0.000000e+00> : vector<1xf32>
    %240 = vector.multi_reduction <add>, %233, %cst_113 [1] : vector<1x8xf32> to vector<1xf32>
    %241 = vector.shape_cast %240 : vector<1xf32> to vector<1x1xf32>
    %cst_114 = arith.constant dense<0.000000e+00> : vector<1xf32>
    %242 = vector.multi_reduction <add>, %239, %cst_114 [1] : vector<1x8xf32> to vector<1xf32>
    %243 = vector.shape_cast %242 : vector<1xf32> to vector<1x1xf32>
    %244 = arith.addf %241, %243 : vector<1x1xf32>
    %245 = arith.mulf %26, %233 : vector<1x8xf32>
    %cst_115 = arith.constant dense<0.000000e+00> : vector<1xf32>
    %246 = vector.multi_reduction <add>, %245, %cst_115 [1] : vector<1x8xf32> to vector<1xf32>
    %247 = vector.shape_cast %246 : vector<1xf32> to vector<1x1xf32>
    %cst_116 = arith.constant 2.500000e-01 : f32
    %248 = vector.broadcast %cst_116 : f32 to vector<8x8xf32>
    %249 = arith.mulf %248, %227 : vector<8x8xf32>
    %250 = arith.addf %189, %249 : vector<8x8xf32>
    %cst_117 = arith.constant 2.500000e-01 : f32
    %251 = vector.broadcast %cst_117 : f32 to vector<8x8xf32>
    %252 = arith.mulf %251, %214 : vector<8x8xf32>
    %253 = arith.addf %192, %252 : vector<8x8xf32>
    %254 = arith.subf %214, %189 : vector<8x8xf32>
    %255 = arith.subf %214, %189 : vector<8x8xf32>
    %256 = arith.mulf %254, %255 : vector<8x8xf32>
    %cst_118 = arith.constant dense<0.000000e+00> : vector<8xf32>
    %257 = vector.multi_reduction <add>, %256, %cst_118 [0] : vector<8x8xf32> to vector<8xf32>
    %258 = vector.shape_cast %257 : vector<8xf32> to vector<1x8xf32>
    %cst_119 = arith.constant dense<0.000000e+00> : vector<1xf32>
    %259 = vector.multi_reduction <add>, %258, %cst_119 [1] : vector<1x8xf32> to vector<1xf32>
    %260 = vector.shape_cast %259 : vector<1xf32> to vector<1x1xf32>
    %261 = math.sqrt %260 : vector<1x1xf32>
    %262 = arith.addf %201, %261 : vector<1x1xf32>
    %263 = arith.subf %250, %189 : vector<8x8xf32>
    %264 = arith.truncf %263 : vector<8x8xf32> to vector<8x8xbf16>
    %c0_120 = arith.constant 0 : index
    %c0_121 = arith.constant 0 : index
    %265 = vector.load %arg5[%c0_120, %c0_121] : memref<8x2xbf16, #tpu.memory_space<vmem>>, vector<8x2xbf16>
    %cst_122 = arith.constant dense<0.000000e+00> : vector<8x2xf32>
    %266 = tpu.matmul %264, %265, %cst_122 {dimension_numbers = #tpu.dot_dimension_numbers<[1], [0], [0], [1], [0, 0, 1, 1], [], []>} : vector<8x8xbf16>, vector<8x2xbf16>, vector<8x2xf32> -> vector<8x2xf32>
    %267 = arith.mulf %266, %266 : vector<8x2xf32>
    %cst_123 = arith.constant dense<0.000000e+00> : vector<2xf32>
    %268 = vector.multi_reduction <add>, %267, %cst_123 [0] : vector<8x2xf32> to vector<2xf32>
    %269 = vector.shape_cast %268 : vector<2xf32> to vector<1x2xf32>
    %cst_124 = arith.constant dense<0.000000e+00> : vector<1xf32>
    %270 = vector.multi_reduction <add>, %269, %cst_124 [1] : vector<1x2xf32> to vector<1xf32>
    %271 = vector.shape_cast %270 : vector<1xf32> to vector<1x1xf32>
    %272 = math.sqrt %271 : vector<1x1xf32>
    %273 = arith.addf %212, %272 : vector<1x1xf32>
    %c0_125 = arith.constant 0 : index
    %c0_126 = arith.constant 0 : index
    %274 = vector.load %arg22[%c0_125, %c0_126] : memref<16x8xf32, #tpu.memory_space<vmem>>, vector<8x8xf32>
    tpu.vector_store %arg22[%c0_125, %c0_126], %250 {strides = array<i32>} : memref<16x8xf32, #tpu.memory_space<vmem>>, vector<8x8xf32>,
    %c8 = arith.constant 8 : index
    %c0_127 = arith.constant 0 : index
    %275 = vector.load %arg22[%c8, %c0_127] : memref<16x8xf32, #tpu.memory_space<vmem>>, vector<8x8xf32>
    tpu.vector_store %arg22[%c8, %c0_127], %253 {strides = array<i32>} : memref<16x8xf32, #tpu.memory_space<vmem>>, vector<8x8xf32>,
    %276 = tpu.concatenate %262, %273, %244, %247 in 1 : vector<1x1xf32>, vector<1x1xf32>, vector<1x1xf32>, vector<1x1xf32> -> vector<1x4xf32>
    %c0_128 = arith.constant 0 : index
    %c0_129 = arith.constant 0 : index
    %277 = vector.load %arg23[%c0_128, %c0_129] : memref<1x4xf32, #tpu.memory_space<vmem>>, vector<1x4xf32>
    tpu.vector_store %arg23[%c0_128, %c0_129], %276 {strides = array<i32>} : memref<1x4xf32, #tpu.memory_space<vmem>>, vector<1x4xf32>,
    return
  }
}

</mosaic_0001>

<bundles_post_ra>
// kernel: tpu_custom_call.1
= control target key start
LH: loop header
LB: loop body
LE: loop exit
PB: predicated region body
PF: predicated region fallthrough
CT: control target
= control target key end

     0   :  { %s2597_s0 = inlined_call_operand.vmem [shape: f32[16,8], index: 0, kind: input, shape index: {}]   ;;  %s2598_s1 = inlined_call_operand.vmem [shape: f32[8,8], index: 1, kind: input, shape index: {}]   ;;  %s2599_s2 = inlined_call_operand.vmem [shape: f32[1,8], index: 2, kind: input, shape index: {}]   ;;  %s2600_s3 = inlined_call_operand.vmem [shape: f32[1,2], index: 3, kind: input, shape index: {}]   ;;  %s2601_s4 = inlined_call_operand.vmem [shape: bf16[2,8], index: 4, kind: input, shape index: {}]   ;;  %s2602_s5 = inlined_call_operand.vmem [shape: bf16[8,2], index: 5, kind: input, shape index: {}]   ;;  %s2603_s6 = inlined_call_operand.vmem [shape: bf16[8,8], index: 6, kind: input, shape index: {}]   ;;  %s2604_s7 = inlined_call_operand.vmem [shape: bf16[8,8], index: 7, kind: input, shape index: {}]   ;;  %s2605_s8 = inlined_call_operand.vmem [shape: bf16[8,8], index: 8, kind: input, shape index: {}]   ;;  %s2606_s9 = inlined_call_operand.vmem [shape: bf16[8,8], index: 9, kind: input, shape index: {}]   ;;  %s2607_s10 = inlined_call_operand.vmem [shape: bf16[8,8], index: 10, kind: input, shape index: {}]   ;;  %s2608_s11 = inlined_call_operand.vmem [shape: f32[64,16], index: 11, kind: input, shape index: {}]   ;;  %s2609_s12 = inlined_call_operand.vmem [shape: f32[64,1], index: 12, kind: input, shape index: {}]   ;;  %s2610_s13 = inlined_call_operand.vmem [shape: f32[16,8], index: 13, kind: input, shape index: {}]   ;;  %s2611_s14 = inlined_call_operand.vmem [shape: f32[16,1], index: 14, kind: input, shape index: {}]   ;;  %s2612_s15 = inlined_call_operand.vmem [shape: f32[10,64], index: 15, kind: input, shape index: {}]   ;;  %s2613_s16 = inlined_call_operand.vmem [shape: f32[10,1], index: 16, kind: input, shape index: {}]   ;;  %s2614_s17 = inlined_call_operand.vmem [shape: f32[1,64], index: 17, kind: input, shape index: {}]   ;;  %s2615_s18 = inlined_call_operand.vmem [shape: f32[2,16], index: 18, kind: input, shape index: {}]   ;;  %s2616_s19 = inlined_call_operand.vmem [shape: f32[2,1], index: 19, kind: input, shape index: {}]   ;;  %s2617_s20 = inlined_call_operand.vmem [shape: f32[8,64], index: 20, kind: input, shape index: {}]   ;;  %s2618_s21 = inlined_call_operand.vmem [shape: f32[8,1], index: 21, kind: input, shape index: {}]   ;;  %s2619_s22 = inlined_call_operand.vmem [shape: f32[16,8], index: 22, kind: output, shape index: {0}]   ;;  %s2620_s23 = inlined_call_operand.hbm [shape: f32[1,4], index: 23, kind: output, shape index: {1}]  }
   0x1   :  { %2622 = sst [smem:[#allocation5_spill]] %s2597_s0 }
   0x2   :  { %2623 = sst [smem:[#allocation6_spill]] %s2598_s1 }
   0x3   :  { %2624 = sst [smem:[#allocation7_spill]] %s2599_s2 }
   0x4   :  { %2625 = sst [smem:[#allocation8_spill]] %s2600_s3 }
   0x5   :  { %2626 = sst [smem:[#allocation9_spill]] %s2601_s4 }
   0x6   :  { %2627 = sst [smem:[#allocation10_spill]] %s2602_s5 }
   0x7   :  { %2628 = sst [smem:[#allocation11_spill]] %s2603_s6 }
   0x8   :  { %2629 = sst [smem:[#allocation12_spill]] %s2604_s7 }
   0x9   :  { %s2630_s24 = sld [smem:[#allocation6_spill]]  ;;  %v271_v1 = vld [vmem:[%s2610_s13] sm:$0xff]  ;;  %vm286_vm0 = vcmask 64512   ;;  %s2631_s2 = sld [smem:[#allocation5_spill]]  ;;  %vm133_vm1 = vcmask 130048   ;;  %v272_v4 = vld [vmem:[%s2610_s13 + $0x8] sm:$0xff] }
   0xa   :  { %1844 = vmatprep.mubr.msk.f32.mxu1 %vm286_vm0, %v271_v1  ;;  %v75_v5 = vld [vmem:[%s2608_s11] sm:$0xff]  ;;  %v2134_v7 = vmov 0   ;;  %v87_v9 = vld [vmem:[%s2609_s12 + $0x10] sm:$0xff]  ;;  %v76_v10 = vld [vmem:[%s2608_s11 + $0x8] sm:$0xff] }
   0xb   :  { %1830 = vmatprep.mubr.msk.f32.mxu0 %vm133_vm1, %v75_v5  ;;  %2058 = vset.pattern.permute.xlu0 %v2134_v7  ;;  %v85_v8 = vld [vmem:[%s2609_s12] sm:$0xff]  ;;  %v77_v11 = vld [vmem:[%s2608_s11 + $0x10] sm:$0xff]  ;;  %v86_v12 = vld [vmem:[%s2609_s12 + $0x8] sm:$0xff] }
   0xc   :  { %2059 = vset.pattern.permute.xlu1 %v2134_v7  ;;  %95 = vperm.xlu0 %2058, %v85_v8   ;;  %v88_v13 = vld [vmem:[%s2609_s12 + $0x18] sm:$0xff] }
   0xd   :  { %105 = vperm.xlu1 %2059, %v87_v9   ;;  %v78_v14 = vld [vmem:[%s2608_s11 + $0x18] sm:$0xff] }
   0xf   :  { %v273_v0 = vld [vmem:[%s2630_s24] sm:$0xff]  ;;  %v84_v3 = vld [vmem:[%s2631_s2 + $0x8] sm:$0xff] }
  0x10   :  { %v83_v2 = vld [vmem:[%s2631_s2] sm:$0xff]  ;;  %1842 = vmatprep.subr.mxu1 %v273_v0  ;;  %100 = vperm.xlu0 %2058, %v86_v12  }
  0x11   :  { %1843 = vmatpush3.msra.mxu1 %v273_v0  ;;  %v2003_v6 = vpack.c.bf16 %v84_v3, %v83_v2 }
  0x12   :  { %1845 = vmatmul.mubr.msk.f32.vlgmr.msra.gmra.mrb[0].mxu1 %vm286_vm0, %v272_v4 }
  0x13   :  { %2004 = vmatprep.subr.bf16.mxu0 %v2003_v6 }
  0x14   :  { %2006 = vmatpush3.bf16.msra.mxu0 %v2003_v6 }
  0x17   :  { %1831 = vmatmul.mubr.msk.f32.vlgmr.msra.gmra.mrb[0].mxu0 %vm133_vm1, %v76_v10 }
  0x18   :  { %1833 = vmatprep.mubr.msk.f32.mxu0 %vm133_vm1, %v77_v11 }
  0x19   :  { %29 = vsyncpa [#allocation3], 0  ;;  %v79_v15 = vld [vmem:[%s2608_s11 + $0x20] sm:$0xff]  ;;  %110 = vperm.xlu1 %2059, %v88_v13   ;;  %v90_v17 = vld [vmem:[%s2609_s12 + $0x28] sm:$0xff]  ;;  %vm384_vm2 = vcmask 523264   ;;  %v2135_v30 = vmov 0.0|0.0  }
  0x1a   :  { %v89_v16 = vld [vmem:[%s2609_s12 + $0x20] sm:$0xff]  ;;  %v80_v18 = vld [vmem:[%s2608_s11 + $0x28] sm:$0xff]  ;;  %v81_v19 = vld [vmem:[%s2608_s11 + $0x30] sm:$0xff]  ;;  %2026 = vmatprep.subr.bf16.mxu0 %v2135_v30  ;;  %vm2136_vm3 = vmmov 0   ;;  %v2137_v31 = vmov 0.0   ;;  %vm570_vm4 = vcmask 1043456  }
  0x1b   :  { %1834 = vmatmul.mubr.msk.f32.gmra.mrb[2].mxu0 %vm133_vm1, %v78_v14  ;;  %115 = vperm.xlu0 %2058, %v89_v16   ;;  %v91_v20 = vld [vmem:[%s2609_s12 + $0x30] sm:$0xff]  ;;  %v92_v21 = vld [vmem:[%s2609_s12 + $0x38] sm:$0xff]  ;;  %v274_v23 = vld [vmem:[%s2611_s14] sm:$0xff]  ;;  %s2633_s0 = sld [smem:[#allocation12_spill]]  ;;  %s2634_s13 = sld [smem:[#allocation10_spill]]  ;;  %vm1029_vm5 = vcmask 1040384  }
  0x1c   :  { %1836 = vmatprep.mubr.msk.f32.mxu0 %vm133_vm1, %v79_v15  ;;  %v82_v22 = vld [vmem:[%s2608_s11 + $0x38] sm:$0xff]  ;;  %v275_v24 = vld [vmem:[%s2611_s14 + $0x8] sm:$0xff]  ;;  %v474_v26 = vld [vmem:[%s2616_s19] sm:$0x3]  ;;  %s2635_s24 = sld [smem:[#allocation9_spill]]  ;;  %s2636_s26 = sld [smem:[#allocation8_spill]] }
  0x1d   :  { %120 = vperm.xlu1 %2059, %v90_v17   ;;  %v373_v25 = vld [vmem:[%s2613_s16 + $0x8] sm:$0x3]  ;;  %v887_v27 = vld [vmem:[%s2618_s21] sm:$0xff]  ;;  %vm1025_vm6 = vcmask 15360   ;;  %s2637_s21 = sld [smem:[#allocation7_spill]]  ;;  %vm1579_vm9 = vcmask 58369  }
  0x1e   :  { %v372_v28 = vld [vmem:[%s2613_s16] sm:$0xff]  ;;  %v371_v13 = vld [vmem:[%s2612_s15 + $0x8] sm:$0x3]  ;;  %vm1575_vm10 = vcmask 57344  }
  0x1f   :  { %1837 = vmatmul.mubr.msk.f32.gmra.mrb[4].mxu0 %vm133_vm1, %v80_v18  ;;  %125 = vperm.xlu0 %2058, %v91_v20   ;;  %v370_v29 = vld [vmem:[%s2612_s15] sm:$0xff]  ;;  %s2139_s15 = smov [#allocation2]  }
  0x20   :  { %1839 = vmatprep.mubr.msk.f32.mxu0 %vm133_vm1, %v81_v19  ;;  %1863 = vmatprep.mubr.msk.f32.mxu1 %vm384_vm2, %v370_v29  ;;  %v557_v14 = vld [vmem:[%s2605_s8] sm:$0xf] }
  0x21   :  { %130 = vperm.xlu1 %2059, %v92_v21   ;;  %v473_v15 = vld [vmem:[%s2615_s18] sm:$0x3]  ;;  %v572_v16 = vsel %vm570_vm4, %v557_v14, 0  ;;  %s2632_s18 = sld [smem:[#allocation11_spill]] }
  0x23   :  { %1840 = vmatmul.mubr.msk.f32.gmra.mrb[6].mxu0 %vm133_vm1, %v82_v22  ;;  %278 = vperm.xlu0 %2058, %v274_v23  }
  0x24   :  { %1899 = vmatprep.mubr.msk.f32.mxu0 %vm2136_vm3, %v2137_v31 }
  0x25   :  { %283 = vperm.xlu1 %2059, %v275_v24  }
  0x27   :  { %381 = vperm.xlu0 %2058, %v373_v25   ;;  %v640_v17 = vld [vmem:[%s2632_s18] sm:$0xf]  ;;  %s1700_s18 = sshll.u32 %s2139_s15, 4  ;;  %s1701_s18 = int_to_ptr.vmem [resolvable:$true] %s1700_s18 }
  0x28   :  { %v722_v18 = vsel %vm570_vm4, %v640_v17, 0  ;;  %s2110_s7 = scalar_lea.vmem %s1701_s18, 16  ;;  %s2114_s28 = scalar_lea.vmem %s1701_s18, 32 }
  0x29   :  { %477 = vperm.xlu1 %2059, %v474_v26   ;;  %p2111_p0 = scmp.ne.s32.totalorder %s1701_s18, %s2110_s7  ;;  %p2115_p1 = scmp.lt.s32.totalorder %s1701_s18, %s1701_s18 }
  0x2a   :  { %p2116_p2 = scmp.lt.s32.totalorder %s2114_s28, %s2110_s7 }
  0x2b   :  { %890 = vperm.xlu0 %2058, %v887_v27  }
  0x2c   :  { %p2117_p3 = por %p2116_p2, %p2115_p1 }
  0x2d   :  { %376 = vperm.xlu1 %2059, %v372_v28  }
  0x2e   :  { %p2118_p4 = pnand %p2117_p3, %p2111_p0 }
  0x8b   :  { %v96_v33 = vpop.permute.xlu0 %95 }
  0x8c   :  { %v106_v32 = vpop.permute.xlu1 %105 }
  0x8f   :  { %v101_v35 = vpop.permute.xlu0 %100 }
  0x98   :  { %v111_v34 = vpop.permute.xlu1 %110 }
  0x9a   :  { %v116_v37 = vpop.permute.xlu0 %115 }
  0x9c   :  { %v121_v36 = vpop.permute.xlu1 %120 }
  0x9e   :  { %v126_v39 = vpop.permute.xlu0 %125 }
  0xa0   :  { %v131_v38 = vpop.permute.xlu1 %130 }
  0xa2   :  { %v279_v42 = vpop.permute.xlu0 %278 }
  0xa4   :  { %v284_v40 = vpop.permute.xlu1 %283 }
  0xa6   :  { %v382_v19 = vpop.permute.xlu0 %381 }
  0xe5   :  { %v1846_v41 = vpop.f32.mrb[0].mxu1 }
  0xe6   :  { %v365_v43 = vadd.f32 %v1846_v41, %v284_v40  ;;  %v359_v44 = vpop.f32.mrb[1].mxu1  ;;  %v641_v41 = vld [vmem:[%s2614_s17] sm:$0x1] }
  0xe7   :  { %v360_v45 = vadd.f32 %v359_v44, %v279_v42  ;;  %v805_v42 = vld [vmem:[%s2633_s0] sm:$0xf] }
  0xe8   :  { %2060 = vtanh.f32 %v365_v43  ;;  %v819_v43 = vsel %vm570_vm4, %v805_v42, 0 }
  0xe9   :  { %2062 = vtanh.f32 %v360_v45 }
  0xea   :  { %v1832_v46 = vpop.f32.mrb[0].mxu0 }
  0xeb   :  { %v230_v47 = vadd.f32 %v1832_v46, %v101_v35  ;;  %v224_v48 = vpop.f32.mrb[1].mxu0 }
  0xec   :  { %v225_v49 = vadd.f32 %v224_v48, %v96_v33  ;;  %v478_v48 = vpop.permute.xlu1 %477 }
  0xed   :  { %2064 = vtanh.f32 %v230_v47 }
  0xee   :  { %2066 = vtanh.f32 %v225_v49  ;;  %v1835_v50 = vpop.f32.mrb[2].mxu0 }
  0xef   :  { %v240_v51 = vadd.f32 %v1835_v50, %v111_v34  ;;  %v234_v52 = vpop.f32.mrb[3].mxu0 }
  0xf0   :  { %v235_v53 = vadd.f32 %v234_v52, %v106_v32 }
  0xf1   :  { %2068 = vtanh.f32 %v240_v51 }
  0xf2   :  { %v2061_v54 = vpop.eup %2060  ;;  %2070 = vtanh.f32 %v235_v53  ;;  %v1838_v55 = vpop.f32.mrb[4].mxu0 }
  0xf3   :  { %v2063_v56 = vpop.eup %2062  ;;  %v250_v57 = vadd.f32 %v1838_v55, %v121_v36  ;;  %v244_v58 = vpop.f32.mrb[5].mxu0 }
  0xf4   :  { %v245_v59 = vadd.f32 %v244_v58, %v116_v37  ;;  %v2024_v60 = vpack.c.bf16 %v2061_v54, %v2063_v56 }
  0xf5   :  { %2072 = vtanh.f32 %v250_v57  ;;  %v789_v57 = vlaneseq }
  0xf6   :  { %2074 = vtanh.f32 %v245_v59  ;;  %v1841_v61 = vpop.f32.mrb[6].mxu0 }
  0xf7   :  { %v2065_v62 = vpop.eup %2064  ;;  %v260_v63 = vadd.f32 %v1841_v61, %v131_v38  ;;  %v254_v0 = vpop.f32.mrb[7].mxu0  ;;  %v2411_v58 = vshrl.u32 %v789_v57, 7 }
  0xf8   :  { %v2067_v1 = vpop.eup %2066  ;;  %v255_v2 = vadd.f32 %v254_v0, %v126_v39 }
  0xf9   :  { %2076 = vtanh.f32 %v260_v63  ;;  %v2007_v3 = vpack.c.bf16 %v2065_v62, %v2067_v1  ;;  %v2414_v59 = vsub.s32 0, %v2411_v58 }
  0xfa   :  { %2078 = vtanh.f32 %v255_v2 }
  0xfb   :  { %v2069_v4 = vpop.eup %2068  ;;  %2008 = vmatprep.subr.bf16.mxu1 %v2007_v3 }
  0xfc   :  { %v2071_v5 = vpop.eup %2070  ;;  %2010 = vmatpush3.bf16.msra.mxu1 %v2007_v3 }
  0xfd   :  { %v2011_v6 = vpack.c.bf16 %v2069_v4, %v2071_v5 }
  0xff   :  { %v2073_v7 = vpop.eup %2072  ;;  %2012 = vmatprep.subr.bf16.mxu1 %v2011_v6 }
 0x100   :  { %v2075_v8 = vpop.eup %2074  ;;  %2014 = vmatpush3.bf16.msra.mxu1 %v2011_v6 }
 0x101   :  { %v2015_v9 = vpack.c.bf16 %v2073_v7, %v2075_v8 }
 0x103   :  { %v2077_v10 = vpop.eup %2076  ;;  %2016 = vmatprep.subr.bf16.mxu1 %v2015_v9 }
 0x104   :  { %v2079_v11 = vpop.eup %2078  ;;  %2018 = vmatpush3.bf16.msra.mxu1 %v2015_v9 }
 0x105   :  { %v2019_v12 = vpack.c.bf16 %v2077_v10, %v2079_v11 }
 0x107   :  { %2020 = vmatprep.subr.bf16.mxu1 %v2019_v12 }
 0x108   :  { %2022 = vmatpush3.bf16.msra.mxu1 %v2019_v12 }
 0x109   :  { %2023 = vmatprep.subr.bf16.mxu1 %v2135_v30 }
 0x10b   :  { %1864 = vmatmul.mubr.msk.f32.vlgmr.msra.gmra.mrb[2].mxu1 %vm384_vm2, %v371_v13 }
 0x10c   :  { %2025 = vmatpush3.bf16.msra.mxu1 %v2024_v60  ;;  %1870 = vmatprep.mubr.msk.f32.mxu1 %vm2136_vm3, %v2137_v31 }
 0x10d   :  { %2050 = vmatprep.subr.msk.bf16.mxu1 %vm570_vm4, %v557_v14 }
 0x10f   :  { %1871 = vmatmul.mubr.msk.f32.vlgmr.msra.gmra.mrb[4].mxu1 %vm133_vm1, %v473_v15 }
 0x110   :  { %1874 = vmatpush3.bf16.msra.mxu1 %v572_v16  ;;  %1875 = vmatprep.mubr.msk.bf16.mxu1 %vm286_vm0, %v2007_v3 }
 0x111   :  { %1902 = vmatprep.subr.bf16.mxu1 %v2137_v31 }
 0x113   :  { %1876 = vmatmul.mubr.msk.bf16.vlgmr.msra.gmra.mrb[8].mxu1 %vm286_vm0, %v2011_v6 }
 0x114   :  { %1879 = vmatprep.mubr.msk.bf16.mxu1 %vm286_vm0, %v2015_v9  ;;  %1903 = vmatpush3.bf16.msra.mxu1 %v722_v18 }
 0x115   :  { %1943 = vmatprep.subr.bf16.mxu1 %v2137_v31 }
 0x11b   :  { %1880 = vmatmul.mubr.msk.bf16.gmra.mrb[12].mxu1 %vm286_vm0, %v2019_v12 }
 0x11c   :  { %1904 = vmatprep.mubr.msk.bf16.mxu1 %vm2136_vm3, %v2137_v31 }
 0x1de   :  { %v1865_v20 = vpop.f32.mrb[2].mxu1 }
 0x1df   :  { %v2386_v21 = vadd.f32 %v1865_v20, %v382_v19  ;;  %v2388_v22 = vpop.f32.mrb[3].mxu1 }
 0x1e1   :  { %v639_v23 = vpack.c.bf16 %v2386_v21, %v2386_v21 }
 0x1e2   :  { %v549_v24 = vpop.f32.mrb[4].mxu1 }
 0x1e3   :  { %v716_v25 = vshrl.u32 %v639_v23, 16  ;;  %v1872_v26 = vpop.f32.mrb[5].mxu1  ;;  %v2408_v50 = vadd.f32 %v549_v24, %v478_v48  ;;  %v886_v24 = vld [vmem:[%s2617_s20] sm:$0xff] }
 0x1e5   :  { %1905 = vmatmul.mubr.msk.bf16.vlgmr.msra.gmra.mrb[16].mxu1 %vm286_vm0, %v716_v25  ;;  %v968_v25 = vld [vmem:[%s2634_s13] sm:$0xf]  ;;  %vm772_vm8 = vcmp.ne.f32.partialorder %v2408_v50, %v2408_v50 }
 0x1e6   :  { %v1877_v27 = vpop.f32.mrb[8].mxu1  ;;  %1945 = vmatprep.mubr.msk.bf16.mxu1 %vm2136_vm3, %v2137_v31  ;;  %v2437_v26 = vsel %vm570_vm4, %v968_v25, 0  ;;  %v1722_v25 = vmul.f32 -1.442695, %v2386_v21 }
 0x1e7   :  { %v608_v28 = vpop.f32.mrb[9].mxu1 }
 0x1e8   :  { %v1878_v29 = vpop.f32.mrb[10].mxu1 }
 0x1e9   :  { %v2030_v32 = vpack.c.bf16 %v1878_v29, %v1877_v27  ;;  %v611_v33 = vpop.f32.mrb[11].mxu1 }
 0x1ea   :  { %v2027_v34 = vpack.c.bf16 %v611_v33, %v608_v28 }
 0x1ec   :  { %2028 = vmatpush3.bf16.msra.mxu0 %v2027_v34 }
 0x1ed   :  { %2029 = vmatprep.subr.bf16.mxu0 %v2135_v30 }
 0x1ee   :  { %v1881_v35 = vpop.f32.mrb[12].mxu1 }
 0x1ef   :  { %v624_v36 = vpop.f32.mrb[13].mxu1 }
 0x1f0   :  { %v1882_v37 = vpop.f32.mrb[14].mxu1  ;;  %2031 = vmatpush3.bf16.msra.mxu0 %v2030_v32 }
 0x1f1   :  { %v2036_v38 = vpack.c.bf16 %v1882_v37, %v1881_v35  ;;  %v627_v39 = vpop.f32.mrb[15].mxu1  ;;  %2032 = vmatprep.subr.bf16.mxu0 %v2135_v30 }
 0x1f2   :  { %v2033_v40 = vpack.c.bf16 %v627_v39, %v624_v36 }
 0x1f4   :  { %2034 = vmatpush3.bf16.msra.mxu0 %v2033_v40 }
 0x1f5   :  { %2035 = vmatprep.subr.bf16.mxu0 %v2135_v30 }
 0x1f8   :  { %2037 = vmatpush3.bf16.msra.mxu0 %v2036_v38  ;;  %v1737_v38 = vld [vmem:[%s2636_s26] ss:$0 sm:$0xff] }
 0x1f9   :  { %2051 = vmatprep.subr.msk.bf16.mxu0 %vm570_vm4, %v805_v42 }
 0x1fb   :  { %1900 = vmatmul.mubr.msk.f32.vlgmr.msra.gmra.mrb[8].mxu0 %vm384_vm2, %v641_v41 }
 0x1fc   :  { %1909 = vmatpush3.bf16.msra.mxu0 %v819_v43 }
 0x1fd   :  { %2038 = vmatprep.subr.bf16.mxu0 %v2135_v30 }
 0x2b8   :  { %v758_v44 = vpop.f32.mrb[16].mxu1 }
 0x2b9   :  { %v1906_v45 = vpop.f32.mrb[17].mxu1 }
 0x2ba   :  { %v761_v46 = vpop.f32.mrb[18].mxu1  ;;  %v1139_v45 = vld [vmem:[%s2607_s10] sm:$0xf] }
 0x2bb   :  { %v1907_v47 = vpop.f32.mrb[19].mxu1  ;;  %v2466_v46 = vsel %vm570_vm4, %v1139_v45, 0 }
 0x2ce   :  { %v711_v49 = vpop.f32.mrb[8].mxu0 }
 0x2cf   :  { %v759_v51 = vadd.f32 %v758_v44, %v711_v49  ;;  %v1901_v52 = vpop.f32.mrb[9].mxu0 }
 0x2d1   :  { %v764_v53 = vadd.f32 %v759_v51, %v2408_v50 }
 0x2d3   :  { %v1730_v54 = vmul.f32 -1.442695, %v764_v53 }
 0x2d5   :  { %2080 = vpow2.f32 %v1730_v54  ;;  %v774_v54 = vand.u32 2147483647, %v2408_v50 }
 0x2df   :  { %v2081_v55 = vpop.eup %2080 }
 0x2e0   :  { %v768_v56 = vadd.f32 1.0, %v2081_v55  ;;  %v775_v55 = vsub.f32 0.0, %v774_v54 }
 0x2e2   :  { %2082 = vrcp.f32 %v768_v56  ;;  %v776_v56 = vmul.f32 1.442695, %v775_v55 }
 0x2ec   :  { %v2083_v60 = vpop.eup %2082 }
 0x2ed   :  { %v792_v61 = vrot.slane %v2083_v60, %v2414_v59 }
 0x2ef   :  { %v793_v62 = vmul.f32 %v792_v61, %v608_v28  ;;  %v794_v63 = vmul.f32 %v792_v61, %v611_v33  ;;  %v795_v0 = vmul.f32 %v1877_v27, %v792_v61  ;;  %v796_v1 = vmul.f32 %v1878_v29, %v792_v61  ;;  %v891_v28 = vpop.permute.xlu0 %890 }
 0x2f0   :  { %v797_v2 = vmul.f32 %v792_v61, %v624_v36  ;;  %v798_v3 = vmul.f32 %v792_v61, %v627_v39  ;;  %v799_v4 = vmul.f32 %v1881_v35, %v792_v61  ;;  %v800_v5 = vmul.f32 %v1882_v37, %v792_v61  ;;  %v1086_v36 = vld [vmem:[%s2606_s9] sm:$0xf] }
 0x2f1   :  { %v801_v6 = vpack.c.bf16 %v794_v63, %v793_v62  ;;  %v802_v7 = vpack.c.bf16 %v796_v1, %v795_v0  ;;  %v2452_v37 = vsel %vm570_vm4, %v1086_v36, 0  ;;  %v1074_v61 = vld [vmem:[%s2637_s21] sm:$0x1]  ;;  %v377_v1 = vpop.permute.xlu1 %376 }
 0x2f2   :  { %v803_v8 = vpack.c.bf16 %v798_v3, %v797_v2  ;;  %v804_v9 = vpack.c.bf16 %v800_v5, %v799_v4  ;;  %v1075_v63 = vmax.f32 %v1074_v61, 1e-06  ;;  %v458_v3 = vadd.f32 %v2388_v22, %v377_v1 }
 0x2f3   :  { %1910 = vmatprep.mubr.msk.bf16.mxu0 %vm286_vm0, %v801_v6 }
 0x2f4   :  { %1911 = vmatmul.mubr.msk.bf16.vlgmr.msra.gmra.mrb[12].mxu0 %vm286_vm0, %v802_v7 }
 0x2f5   :  { %1914 = vmatprep.mubr.msk.bf16.mxu0 %vm286_vm0, %v803_v8  ;;  %v771_v8 = vmax.f32 %v2408_v50, 0.0 }
 0x2fc   :  { %1915 = vmatmul.mubr.msk.bf16.gmra.mrb[16].mxu0 %vm286_vm0, %v804_v9 }
 0x2fd   :  { %1934 = vmatprep.mubr.msk.f32.mxu0 %vm2136_vm3, %v2137_v31 }
 0x3c7   :  { %v1912_v10 = vpop.f32.mrb[12].mxu0 }
 0x3c8   :  { %v855_v11 = vpop.f32.mrb[13].mxu0 }
 0x3c9   :  { %v1913_v12 = vpop.f32.mrb[14].mxu0 }
 0x3ca   :  { %v2042_v13 = vpack.c.bf16 %v1913_v12, %v1912_v10  ;;  %v858_v14 = vpop.f32.mrb[15].mxu0 }
 0x3cb   :  { %v2039_v15 = vpack.c.bf16 %v858_v14, %v855_v11  ;;  %v1135_v11 = vsub.s32 1, %v2411_v58 }
 0x3cd   :  { %2040 = vmatpush3.bf16.msra.mxu0 %v2039_v15 }
 0x3ce   :  { %2041 = vmatprep.subr.bf16.mxu0 %v2135_v30 }
 0x3cf   :  { %v1916_v16 = vpop.f32.mrb[16].mxu0 }
 0x3d0   :  { %v871_v17 = vpop.f32.mrb[17].mxu0 }
 0x3d1   :  { %v1917_v18 = vpop.f32.mrb[18].mxu0  ;;  %2043 = vmatpush3.bf16.msra.mxu0 %v2042_v13 }
 0x3d2   :  { %v2048_v19 = vpack.c.bf16 %v1917_v18, %v1916_v16  ;;  %v874_v20 = vpop.f32.mrb[19].mxu0  ;;  %2044 = vmatprep.subr.bf16.mxu0 %v2135_v30 }
 0x3d3   :  { %v2045_v23 = vpack.c.bf16 %v874_v20, %v871_v17 }
 0x3d5   :  { %2046 = vmatpush3.bf16.msra.mxu0 %v2045_v23 }
 0x3d6   :  { %2047 = vmatprep.subr.bf16.mxu0 %v2135_v30  ;;  %v1024_v30 = vld [vmem:[%s2635_s24] sm:$0x1] }
 0x3d7   :  { %v1031_v27 = vsel %vm1029_vm5, %v1024_v30, 0 }
 0x3d8   :  { %1944 = vmatpush3.bf16.msra.mxu1 %v1031_v27 }
 0x3d9   :  { %2049 = vmatpush3.bf16.msra.mxu0 %v2048_v19  ;;  %1955 = vmatprep.subr.bf16.mxu1 %v2137_v31 }
 0x3da   :  { %1937 = vmatprep.subr.bf16.mxu0 %v2137_v31 }
 0x3dc   :  { %1935 = vmatmul.mubr.msk.f32.vlgmr.msra.gmra.mrb[10].mxu0 %vm384_vm2, %v886_v24 }
 0x3dd   :  { %1939 = vmatprep.mubr.msk.bf16.mxu0 %vm2136_vm3, %v2137_v31  ;;  %1938 = vmatpush3.bf16.msra.mxu0 %v2437_v26 }
 0x3de   :  { %1949 = vmatprep.subr.bf16.mxu0 %v2137_v31 }
 0x4af   :  { %v962_v29 = vpop.f32.mrb[10].mxu0 }
 0x4b0   :  { %v963_v32 = vadd.f32 %v962_v29, %v891_v28  ;;  %v1936_v33 = vpop.f32.mrb[11].mxu0 }
 0x4b2   :  { %2084 = vtanh.f32 %v963_v32 }
 0x4b3   :  { %2086 = vpow2.f32 %v776_v56 }
 0x4bc   :  { %v2085_v34 = vpop.eup %2084 }
 0x4bd   :  { %v967_v35 = vpack.c.bf16 %v2085_v34, %v2085_v34  ;;  %v2087_v57 = vpop.eup %2086 }
 0x4be   :  { %v778_v60 = vadd.f32 1.0, %v2087_v57  ;;  %v781_v62 = vmul.f32 -0.5, %v2087_v57  ;;  %v784_v4 = vand.u32 2147483647, %v2087_v57 }
 0x4bf   :  { %1940 = vmatmul.mubr.msk.bf16.vlgmr.msra.gmra.mrb[20].mxu0 %vm286_vm0, %v967_v35 }
 0x4c0   :  { %1951 = vmatprep.mubr.msk.bf16.mxu0 %vm2136_vm3, %v2137_v31  ;;  %1950 = vmatpush3.bf16.msra.mxu0 %v2452_v37  ;;  %2088 = vlog2.f32 %v778_v60  ;;  %v782_v2 = vadd.f32 1.0, %v781_v62  ;;  %vm785_vm7 = vcmp.lt.f32.partialorder %v784_v4, 0.0004427343 }
 0x4c1   :  { %1961 = vmatprep.subr.bf16.mxu0 %v2137_v31  ;;  %2090 = vrcp.f32 %v1075_v63 }
 0x4c2   :  { %v783_v6 = vmul.f32 %v2087_v57, %v782_v2  ;;  %2092 = vtanh.f32 %v458_v3 }
 0x4c3   :  { %2094 = vpow2.f32 %v1722_v25 }
 0x4ca   :  { %v2089_v0 = vpop.eup %2088 }
 0x4cb   :  { %v780_v5 = vmul.f32 0.6931472, %v2089_v0  ;;  %v2481_v10 = vpop.eup %2090 }
 0x4cc   :  { %v2491_v22 = vrot.slane %v2481_v10, %v2414_v59  ;;  %v2093_v13 = vpop.eup %2092 }
 0x4cd   :  { %v786_v7 = vsel %vm785_vm7, %v783_v6, %v780_v5  ;;  %v2095_v30 = vpop.eup %2094 }
 0x4ce   :  { %v787_v9 = vadd.f32 %v786_v7, %v771_v8  ;;  %v1084_v16 = vmul.f32 %v2093_v13, %v2491_v22  ;;  %v470_v27 = vadd.f32 1.0, %v2095_v30 }
 0x4d0   :  { %v2487_v12 = vsel %vm772_vm8, %v2408_v50, %v787_v9  ;;  %v1195_v23 = vmul.f32 0.25, %v1084_v16  ;;  %2096 = vrcp.f32 %v470_v27  ;;  %v1197_v56 = vsub.f32 %v1084_v16, %v2093_v13 }
 0x4d1   :  { %v2494_v14 = vrot.slane %v2487_v12, %v1135_v11  ;;  %vm1685_vm8 = vcmask 7168  }
 0x4d2   :  { %v1198_v61 = vmul.f32 %v1197_v56, %v1197_v56 }
 0x4d4   :  { %v1199_v3 = vsel %vm286_vm0, %v1198_v61, 0.0 }
 0x4d5   :  { %v1200_v7 = vrot.slane %v1199_v3, 4 }
 0x4da   :  { %v2509_v28 = vpop.eup %2096 }
 0x4db   :  { %v2513_v29 = vrot.slane %v2509_v28, %v2414_v59 }
 0x592   :  { %v1009_v39 = vpop.f32.mrb[20].mxu0 }
 0x593   :  { %v1022_v40 = vmul.f32 %v1737_v38, %v1009_v39  ;;  %v1941_v41 = vpop.f32.mrb[21].mxu0 }
 0x594   :  { %v1012_v42 = vpop.f32.mrb[22].mxu0 }
 0x595   :  { %v1023_v43 = vpack.c.bf16 %v1022_v40, %v1022_v40  ;;  %v1942_v44 = vpop.f32.mrb[23].mxu0 }
 0x597   :  { %1946 = vmatmul.mubr.msk.bf16.vlgmr.msra.gmra.mrb[20].mxu1 %vm1025_vm6, %v1023_v43 }
 0x598   :  { %1957 = vmatprep.mubr.msk.bf16.mxu1 %vm2136_vm3, %v2137_v31  ;;  %1956 = vmatpush3.bf16.msra.mxu1 %v2466_v46 }
 0x599   :  { %1967 = vmatprep.subr.bf16.mxu1 %v2137_v31 }
 0x66a   :  { %v1067_v47 = vpop.f32.mrb[20].mxu1 }
 0x66b   :  { %v1073_v48 = vsub.f32 %v2085_v34, %v1067_v47  ;;  %v1947_v49 = vpop.f32.mrb[21].mxu1  ;;  %v1191_v34 = vmul.f32 %v2513_v29, %v1084_v16 }
 0x66c   :  { %v1070_v51 = vpop.f32.mrb[22].mxu1 }
 0x66d   :  { %v1085_v52 = vpack.c.bf16 %v1073_v48, %v1073_v48  ;;  %v1948_v53 = vpop.f32.mrb[23].mxu1  ;;  %v1196_v50 = vadd.f32 %v1195_v23, %v1073_v48 }
 0x66f   :  { %1952 = vmatmul.mubr.msk.bf16.vlgmr.msra.gmra.mrb[24].mxu0 %vm286_vm0, %v1085_v52  ;;  %v1282_v24 = vpack.c.bf16 %v1196_v50, %v1196_v50 }
 0x670   :  { %1962 = vmatpush3.bf16.msra.mxu0 %v2437_v26  ;;  %1963 = vmatprep.mubr.msk.bf16.mxu0 %vm2136_vm3, %v2137_v31 }
 0x671   :  { %1973 = vmatprep.subr.bf16.mxu0 %v2137_v31 }
 0x742   :  { %v1127_v15 = vpop.f32.mrb[24].mxu0 }
 0x743   :  { %v1137_v17 = vmul.f32 %v2494_v14, %v1127_v15  ;;  %v1953_v18 = vpop.f32.mrb[25].mxu0 }
 0x744   :  { %v1130_v19 = vpop.f32.mrb[26].mxu0 }
 0x745   :  { %v1138_v20 = vpack.c.bf16 %v1137_v17, %v1137_v17  ;;  %v1954_v58 = vpop.f32.mrb[27].mxu0  ;;  %v1201_v17 = vadd.f32 %v1200_v7, %v1199_v3 }
 0x747   :  { %1958 = vmatmul.mubr.msk.bf16.vlgmr.msra.gmra.mrb[24].mxu1 %vm286_vm0, %v1138_v20 }
 0x748   :  { %1968 = vmatpush3.bf16.msra.mxu1 %v2452_v37  ;;  %1969 = vmatprep.mubr.msk.bf16.mxu1 %vm2136_vm3, %v2137_v31 }
 0x749   :  { %1979 = vmatprep.subr.bf16.mxu1 %v2137_v31 }
 0x74f   :  { %1970 = vmatmul.mubr.msk.bf16.vlgmr.msra.gmra.mrb[28].mxu1 %vm286_vm0, %v1282_v24 }
 0x750   :  { %1980 = vmatpush3.bf16.msra.mxu1 %v2437_v26  ;;  %1981 = vmatprep.mubr.msk.bf16.mxu1 %vm2136_vm3, %v2137_v31 }
 0x751   :  { %1991 = vmatprep.subr.bf16.mxu1 %v2137_v31 }
 0x81a   :  { %v1180_v32 = vpop.f32.mrb[24].mxu1 }
 0x81b   :  { %v1186_v33 = vsub.f32 0.0, %v1180_v32  ;;  %v1959_v35 = vpop.f32.mrb[25].mxu1 }
 0x81c   :  { %v1183_v36 = vpop.f32.mrb[26].mxu1 }
 0x81d   :  { %v1192_v38 = vsub.f32 %v1186_v33, %v1191_v34  ;;  %v1960_v39 = vpop.f32.mrb[27].mxu1 }
 0x81f   :  { %v1193_v40 = vmul.f32 0.25, %v1192_v38 }
 0x821   :  { %v1194_v21 = vadd.f32 %v2093_v13, %v1193_v40  ;;  %v1202_v40 = vrot.slane %v1201_v17, 2 }
 0x822   :  { %v1320_v41 = vpop.f32.mrb[28].mxu1 }
 0x823   :  { %v1971_v42 = vpop.f32.mrb[29].mxu1  ;;  %v1217_v43 = vsub.f32 %v1194_v21, %v2093_v13  ;;  %v1281_v59 = vmul.f32 %v1194_v21, %v2491_v22  ;;  %v1326_v48 = vmul.f32 %v1320_v41, %v2494_v14 }
 0x824   :  { %v1323_v44 = vpop.f32.mrb[30].mxu1 }
 0x825   :  { %v1972_v45 = vpop.f32.mrb[31].mxu1  ;;  %v1218_v47 = vpack.c.bf16 %v1217_v43, %v1217_v43  ;;  %v1327_v49 = vpack.c.bf16 %v1326_v48, %v1326_v48  ;;  %v1376_v51 = vmul.f32 0.25, %v1281_v59  ;;  %v1372_v1 = vmul.f32 %v1281_v59, %v2513_v29 }
 0x826   :  { %v1203_v48 = vadd.f32 %v1202_v40, %v1201_v17 }
 0x827   :  { %1964 = vmatmul.mubr.msk.bf16.vlgmr.msra.gmra.mrb[28].mxu0 %vm286_vm0, %v1218_v47  ;;  %v1377_v52 = vadd.f32 %v1376_v51, %v1196_v50 }
 0x828   :  { %1974 = vmatpush3.bf16.msra.mxu0 %v2466_v46  ;;  %1975 = vmatprep.mubr.msk.bf16.mxu0 %vm2136_vm3, %v2137_v31  ;;  %v1204_v56 = vrot.slane %v1203_v48, 1 }
 0x829   :  { %1985 = vmatprep.subr.bf16.mxu0 %v2137_v31  ;;  %v1463_v53 = vpack.c.bf16 %v1377_v52, %v1377_v52 }
 0x82f   :  { %1976 = vmatmul.mubr.msk.bf16.vlgmr.msra.gmra.mrb[32].mxu0 %vm286_vm0, %v1327_v49 }
 0x830   :  { %1986 = vmatpush3.bf16.msra.mxu0 %v2452_v37  ;;  %1987 = vmatprep.mubr.msk.bf16.mxu0 %vm2136_vm3, %v2137_v31  ;;  %v1378_v37 = vsub.f32 %v1281_v59, %v1194_v21 }
 0x831   :  { %1997 = vmatprep.subr.bf16.mxu0 %v2137_v31 }
 0x832   :  { %v1379_v63 = vmul.f32 %v1378_v37, %v1378_v37 }
 0x834   :  { %v1380_v8 = vsel %vm286_vm0, %v1379_v63, 0.0 }
 0x835   :  { %v1381_v15 = vrot.slane %v1380_v8, 4 }
 0x837   :  { %1988 = vmatmul.mubr.msk.bf16.vlgmr.msra.gmra.mrb[36].mxu0 %vm286_vm0, %v1463_v53  ;;  %v1382_v33 = vadd.f32 %v1381_v15, %v1380_v8 }
 0x838   :  { %1998 = vmatpush3.bf16.msra.mxu0 %v2437_v26  ;;  %1999 = vmatprep.mubr.msk.bf16.mxu0 %vm2136_vm3, %v2137_v31 }
 0x839   :  { %v1383_v47 = vrot.slane %v1382_v33, 2 }
 0x8fa   :  { %v1256_v54 = vpop.f32.mrb[28].mxu0 }
 0x8fb   :  { %v1965_v55 = vpop.f32.mrb[29].mxu0  ;;  %v1262_v4 = vmul.f32 %v1256_v54, %v1256_v54 }
 0x8fc   :  { %v1259_v57 = vpop.f32.mrb[30].mxu0 }
 0x8fd   :  { %v1966_v60 = vpop.f32.mrb[31].mxu0  ;;  %v1263_v11 = vsel %vm1025_vm6, %v1262_v4, 0.0 }
 0x8fe   :  { %v1264_v18 = vrot.slane %v1263_v11, 4  ;;  %v1565_v60 = vmul.f32 0.5, %v2487_v12 }
 0x900   :  { %v1265_v39 = vadd.f32 %v1264_v18, %v1263_v11 }
 0x902   :  { %v1365_v62 = vpop.f32.mrb[32].mxu0 }
 0x903   :  { %v1371_v0 = vsub.f32 0.0, %v1365_v62  ;;  %v1977_v2 = vpop.f32.mrb[33].mxu0 }
 0x904   :  { %v1368_v26 = vpop.f32.mrb[34].mxu0 }
 0x905   :  { %v1373_v5 = vsub.f32 %v1371_v0, %v1372_v1  ;;  %v1978_v6 = vpop.f32.mrb[35].mxu0  ;;  %v1205_v26 = vadd.f32 %v1204_v56, %v1203_v48 }
 0x907   :  { %v1374_v9 = vmul.f32 0.25, %v1373_v5  ;;  %v1206_v12 = vsel %vm286_vm0, %v1205_v26, 0.0 }
 0x909   :  { %v2536_v13 = vadd.f32 %v1374_v9, %v1194_v21 }
 0x90a   :  { %v1501_v16 = vpop.f32.mrb[36].mxu0 }
 0x90b   :  { %v1566_v19 = vmul.f32 %v1501_v16, %v1501_v16  ;;  %v1989_v20 = vpop.f32.mrb[37].mxu0  ;;  %v1398_v58 = vsub.f32 %v2536_v13, %v1194_v21  ;;  %v1555_v23 = vmul.f32 %v2536_v13, %v2536_v13  ;;  %v2543_v24 = vmul.f32 %v2536_v13, %v2491_v22 }
 0x90c   :  { %v1504_v50 = vpop.f32.mrb[38].mxu0  ;;  %v1507_v42 = vmul.f32 %v1501_v16, %v2494_v14 }
 0x90d   :  { %v1567_v25 = vsel %vm286_vm0, %v1566_v19, 0.0  ;;  %v1990_v30 = vpop.f32.mrb[39].mxu0  ;;  %v1399_v27 = vpack.c.bf16 %v1398_v58, %v1398_v58  ;;  %v1556_v32 = vsel %vm286_vm0, %v1555_v23, 0.0  ;;  %v1595_v36 = vsub.f32 %v2543_v24, %v2536_v13 }
 0x90e   :  { %v1568_v34 = vrot.slane %v1567_v25, 4  ;;  %v1557_v35 = vrot.slane %v1556_v32, 4  ;;  %v1593_v38 = vmul.f32 0.25, %v2543_v24  ;;  %v1508_v53 = vpack.c.bf16 %v1507_v42, %v1507_v42 }
 0x90f   :  { %1982 = vmatmul.mubr.msk.bf16.vlgmr.msra.gmra.mrb[32].mxu1 %vm286_vm0, %v1399_v27  ;;  %v1596_v41 = vmul.f32 %v1595_v36, %v1595_v36 }
 0x910   :  { %v1569_v22 = vadd.f32 %v1568_v34, %v1567_v25  ;;  %1992 = vmatpush3.bf16.msra.mxu1 %v2466_v46  ;;  %1993 = vmatprep.mubr.msk.bf16.mxu1 %vm2136_vm3, %v2137_v31  ;;  %v1558_v21 = vadd.f32 %v1557_v35, %v1556_v32  ;;  %v1594_v43 = vadd.f32 %v1593_v38, %v1377_v52  ;;  %v1266_v46 = vrot.slane %v1265_v39, 2 }
 0x911   :  { %v1597_v59 = vsel %vm286_vm0, %v1596_v41, 0.0  ;;  %v1384_v52 = vadd.f32 %v1383_v47, %v1382_v33  ;;  %v1553_v35 = vmul.f32 %v2543_v24, %v2513_v29 }
 0x912   :  { %v1570_v44 = vrot.slane %v1569_v22, 2  ;;  %v1559_v45 = vrot.slane %v1558_v21, 2  ;;  %v1598_v49 = vrot.slane %v1597_v59, 4  ;;  %1680 = vst.msk [vmem:[%s2619_s22 + $0x8] sm:$0xff] %vm286_vm0, %v1594_v43  ;;  %v1267_v62 = vadd.f32 %v1266_v46, %v1265_v39 }
 0x913   :  { %v1385_v1 = vrot.slane %v1384_v52, 1 }
 0x914   :  { %v1571_v51 = vadd.f32 %v1570_v44, %v1569_v22  ;;  %v1560_v31 = vadd.f32 %v1559_v45, %v1558_v21  ;;  %v1599_v54 = vadd.f32 %v1598_v49, %v1597_v59  ;;  %v1268_v5 = vrot.slane %v1267_v62, 1 }
 0x915   :  { %v1386_v7 = vadd.f32 %v1385_v1, %v1384_v52 }
 0x916   :  { %v1572_v55 = vrot.slane %v1571_v51, 1  ;;  %v1561_v14 = vrot.slane %v1560_v31, 1  ;;  %v1600_v57 = vrot.slane %v1599_v54, 2  ;;  %v1269_v9 = vadd.f32 %v1268_v5, %v1267_v62 }
 0x917   :  { %1994 = vmatmul.mubr.msk.bf16.vlgmr.msra.gmra.mrb[36].mxu1 %vm286_vm0, %v1508_v53  ;;  %v1387_v11 = vsel %vm286_vm0, %v1386_v7, 0.0 }
 0x918   :  { %v1573_v37 = vadd.f32 %v1572_v55, %v1571_v51  ;;  %v1562_v61 = vadd.f32 %v1561_v14, %v1560_v31  ;;  %v1601_v2 = vadd.f32 %v1600_v57, %v1599_v54  ;;  %v1270_v16 = vsel %vm1025_vm6, %v1269_v9, 0.0 }
 0x91a   :  { %v1574_v63 = vmul.f32 %v1573_v37, %v1565_v60  ;;  %v1563_v0 = vmul.f32 0.5, %v1562_v61  ;;  %v1602_v8 = vrot.slane %v1601_v2, 1 }
 0x91c   :  { %v1580_v3 = vsel %vm1579_vm9, %v1574_v63, 0.0  ;;  %v1564_v4 = vmul.f32 %v2481_v10, %v1563_v0  ;;  %v1603_v15 = vadd.f32 %v1602_v8, %v1601_v2  ;;  %vm1688_vm9 = vcmask 23552  }
 0x91d   :  { %1581 = vadd.xlane.f32.xlu0 %v1580_v3 }
 0x91e   :  { %v1576_v6 = vsel %vm1575_vm10, %v1564_v4, 0.0  ;;  %v1604_v10 = vsel %vm286_vm0, %v1603_v15, 0.0  ;;  %v1587_v17 = vmul.f32 %v2509_v28, %v1564_v4 }
 0x91f   :  { %1577 = vadd.xlane.f32.xlu1 %v1576_v6 }
 0x920   :  { %v1588_v18 = vsel %vm1575_vm10, %v1587_v17, 0.0  ;;  %vm1690_vm10 = vcmask 24576  }
 0x921   :  { %1207 = vadd.xlane.f32.xlu0 %v1206_v12 }
 0x923   :  { %1388 = vadd.xlane.f32.xlu1 %v1387_v11 }
 0x925   :  { %1271 = vadd.xlane.f32.xlu0 %v1270_v16 }
 0x927   :  { %1605 = vadd.xlane.f32.xlu1 %v1604_v10 }
 0x92b   :  { %1589 = vadd.xlane.f32.xlu1 %v1588_v18 }
 0x9aa   :  { %v1582_v14 = vpop.xlane.xlu0 %1581 }
 0x9ab   :  { %v1584_v52 = vrot.slane %v1582_v14, 1 }
 0x9ac   :  { %v1578_v56 = vpop.xlane.xlu1 %1577 }
 0x9ad   :  { %v1586_v57 = vadd.f32 %v1584_v52, %v1578_v56 }
 0x9ae   :  { %v1208_v60 = vpop.xlane.xlu0 %1207 }
 0x9af   :  { %2098 = vrsqrt.f32 %v1208_v60  ;;  %vm1211_vm11 = vcmp.eq.f32.partialorder %v1208_v60, inf  ;;  %vm1213_vm12 = vcmp.eq.f32.partialorder %v1208_v60, 0.0  ;;  %v1214_v9 = vand.u32 2147483648, %v1208_v60 }
 0x9b0   :  { %v1389_v37 = vpop.xlane.xlu1 %1388 }
 0x9b1   :  { %2100 = vrsqrt.f32 %v1389_v37  ;;  %vm1392_vm13 = vcmp.eq.f32.partialorder %v1389_v37, inf  ;;  %v1395_v15 = vand.u32 2147483648, %v1389_v37  ;;  %vm1394_vm1 = vcmp.eq.f32.partialorder %v1389_v37, 0.0 }
 0x9b2   :  { %v1272_v61 = vpop.xlane.xlu0 %1271 }
 0x9b3   :  { %vm1275_vm15 = vcmp.eq.f32.partialorder %v1272_v61, inf  ;;  %vm1277_vm3 = vcmp.eq.f32.partialorder %v1272_v61, 0.0 }
 0x9b4   :  { %v1606_v63 = vpop.xlane.xlu1 %1605 }
 0x9b5   :  { %vm1611_vm4 = vcmp.eq.f32.partialorder %v1606_v63, 0.0 }
 0x9b9   :  { %v2099_v0 = vpop.eup %2098 }
 0x9ba   :  { %v1210_v7 = vmul.f32 %v2099_v0, %v1208_v60 }
 0x9bb   :  { %v2101_v1 = vpop.eup %2100 }
 0x9bc   :  { %v1391_v5 = vmul.f32 %v2101_v1, %v1389_v37  ;;  %v1212_v10 = vsel %vm1211_vm11, %v1208_v60, %v1210_v7 }
 0x9be   :  { %v1393_v11 = vsel %vm1392_vm13, %v1389_v37, %v1391_v5 }
 0x9e2   :  { %v1437_v19 = vpop.f32.mrb[32].mxu1 }
 0x9e3   :  { %v1443_v20 = vmul.f32 %v1437_v19, %v1437_v19  ;;  %v1983_v58 = vpop.f32.mrb[33].mxu1 }
 0x9e4   :  { %v1440_v23 = vpop.f32.mrb[34].mxu1  ;;  %v1278_v58 = vand.u32 2147483648, %v1272_v61 }
 0x9e5   :  { %v1444_v50 = vsel %vm1025_vm6, %v1443_v20, 0.0  ;;  %v1984_v25 = vpop.f32.mrb[35].mxu1  ;;  %v1612_v23 = vand.u32 2147483648, %v1606_v63 }
 0x9e6   :  { %v1445_v30 = vrot.slane %v1444_v50, 4 }
 0x9e8   :  { %v1446_v27 = vadd.f32 %v1445_v30, %v1444_v50  ;;  %v1396_v50 = vsel %vm1394_vm1, %v1395_v15, %v1393_v11 }
 0x9ea   :  { %v1447_v32 = vrot.slane %v1446_v27, 2  ;;  %v1546_v33 = vpop.f32.mrb[36].mxu1 }
 0x9eb   :  { %v1552_v34 = vsub.f32 0.0, %v1546_v33  ;;  %v1995_v28 = vpop.f32.mrb[37].mxu1 }
 0x9ec   :  { %v1549_v36 = vpop.f32.mrb[38].mxu1  ;;  %v1448_v38 = vadd.f32 %v1447_v32, %v1446_v27  ;;  %v1215_v27 = vsel %vm1213_vm12, %v1214_v9, %v1212_v10 }
 0x9ed   :  { %v1554_v39 = vsub.f32 %v1552_v34, %v1553_v35  ;;  %v1996_v40 = vpop.f32.mrb[39].mxu1  ;;  %v1397_v35 = vadd.f32 %v1396_v50, %v1215_v27 }
 0x9ee   :  { %v1449_v22 = vrot.slane %v1448_v38, 1 }
 0x9ef   :  { %v1591_v21 = vmul.f32 0.25, %v1554_v39 }
 0x9f0   :  { %v1450_v41 = vadd.f32 %v1449_v22, %v1448_v38 }
 0x9f1   :  { %v1592_v42 = vadd.f32 %v1591_v21, %v2536_v13 }
 0x9f2   :  { %v1451_v43 = vsel %vm1025_vm6, %v1450_v41, 0.0  ;;  %v1590_v41 = vpop.xlane.xlu1 %1589 }
 0x9f3   :  { %v1615_v44 = vsub.f32 %v1592_v42, %v2536_v13  ;;  %1679 = vst.msk [vmem:[%s2619_s22] sm:$0xff] %vm286_vm0, %v1592_v42  ;;  %1452 = vadd.xlane.f32.xlu0 %v1451_v43  ;;  %s2138_s22 = smov 2  }
 0x9f5   :  { %v1616_v29 = vpack.c.bf16 %v1615_v44, %v1615_v44 }
 0x9f7   :  { %2000 = vmatmul.mubr.msk.bf16.vlgmr.msra.gmra.mrb[40].mxu0 %vm286_vm0, %v1616_v29  ;;  %vm1609_vm0 = vcmp.eq.f32.partialorder %v1606_v63, inf }
 0xa80   :  { %v1453_v62 = vpop.xlane.xlu0 %1452 }
 0xa81   :  { %2102 = vrsqrt.f32 %v1453_v62  ;;  %vm1456_vm14 = vcmp.eq.f32.partialorder %v1453_v62, inf  ;;  %v1459_v17 = vand.u32 2147483648, %v1453_v62  ;;  %vm1458_vm2 = vcmp.eq.f32.partialorder %v1453_v62, 0.0 }
 0xa82   :  { %2104 = vrsqrt.f32 %v1272_v61 }
 0xa83   :  { %2106 = vrsqrt.f32 %v1606_v63 }
 0xa8b   :  { %v2103_v3 = vpop.eup %2102 }
 0xa8c   :  { %v2105_v4 = vpop.eup %2104  ;;  %v1455_v6 = vmul.f32 %v2103_v3, %v1453_v62 }
 0xa8d   :  { %v2107_v26 = vpop.eup %2106  ;;  %v1274_v8 = vmul.f32 %v2105_v4, %v1272_v61 }
 0xa8e   :  { %v1608_v12 = vmul.f32 %v2107_v26, %v1606_v63  ;;  %v1457_v16 = vsel %vm1456_vm14, %v1453_v62, %v1455_v6 }
 0xa8f   :  { %v1276_v18 = vsel %vm1275_vm15, %v1272_v61, %v1274_v8  ;;  %v1460_v25 = vsel %vm1458_vm2, %v1459_v17, %v1457_v16 }
 0xa90   :  { %v1610_v19 = vsel %vm1609_vm0, %v1606_v63, %v1608_v12  ;;  %v1279_v33 = vsel %vm1277_vm3, %v1278_v58, %v1276_v18 }
 0xa91   :  { %v1613_v34 = vsel %vm1611_vm4, %v1612_v23, %v1610_v19  ;;  %v1461_v28 = vadd.f32 %v1460_v25, %v1279_v33 }
 0xa92   :  { %v1614_v39 = vadd.f32 %v1613_v34, %v1397_v35 }
 0xaca   :  { %v1654_v24 = vpop.f32.mrb[40].mxu0 }
 0xacb   :  { %v1660_v45 = vmul.f32 %v1654_v24, %v1654_v24  ;;  %v2001_v47 = vpop.f32.mrb[41].mxu0 }
 0xacc   :  { %v1657_v59 = vpop.f32.mrb[42].mxu0 }
 0xacd   :  { %v1661_v48 = vsel %vm1025_vm6, %v1660_v45, 0.0  ;;  %v2002_v49 = vpop.f32.mrb[43].mxu0 }
 0xace   :  { %v1662_v46 = vrot.slane %v1661_v48, 4 }
 0xad0   :  { %v1663_v51 = vadd.f32 %v1662_v46, %v1661_v48 }
 0xad2   :  { %v1664_v31 = vrot.slane %v1663_v51, 2 }
 0xad4   :  { %v1665_v13 = vadd.f32 %v1664_v31, %v1663_v51 }
 0xad6   :  { %v1666_v53 = vrot.slane %v1665_v13, 1 }
 0xad8   :  { %v1667_v54 = vadd.f32 %v1666_v53, %v1665_v13 }
 0xada   :  { %v1668_v55 = vsel %vm1025_vm6, %v1667_v54, 0.0 }
 0xadb   :  { %1669 = vadd.xlane.f32.xlu0 %v1668_v55 }
 0xaf1   :  { %1682 = vrot.lane.b32.xlu0 %v1586_v57, %s2138_s22 }
 0xb68   :  { %v1670_v2 = vpop.xlane.xlu0 %1669 }
 0xb69   :  { %2108 = vrsqrt.f32 %v1670_v2  ;;  %vm1673_vm5 = vcmp.eq.f32.partialorder %v1670_v2, inf  ;;  %v1676_v32 = vand.u32 2147483648, %v1670_v2  ;;  %vm1675_vm7 = vcmp.eq.f32.partialorder %v1670_v2, 0.0 }
 0xb6c   :  { %v1683_v21 = vpop.permute.xlu0 %1682 }
 0xb73   :  { %v2109_v20 = vpop.eup %2108 }
 0xb74   :  { %v1672_v30 = vmul.f32 %v2109_v20, %v1670_v2 }
 0xb76   :  { %v1674_v36 = vsel %vm1673_vm5, %v1670_v2, %v1672_v30 }
 0xb77   :  { %v1677_v38 = vsel %vm1675_vm7, %v1676_v32, %v1674_v36 }
 0xb78   :  { %v1678_v40 = vadd.f32 %v1677_v38, %v1461_v28 }
 0xb7a   :  { %v1686_v22 = vsel %vm1685_vm8, %v1614_v39, %v1678_v40 }
 0xb7b   :  { %v1687_v42 = vsel %vm1025_vm6, %v1686_v22, %v1683_v21 }
 0xb7c   :  { %v1689_v43 = vsel %vm1688_vm9, %v1687_v42, %v1590_v41 }
 0xb7d   :  { %1691 = vst.msk [vmem:[#allocation2] sm:$0x1] %vm1690_vm10, %v1689_v43 }
 0xb7e   :  { %2121 = shalt.err (!%p2118_p4)
}
 0xb7f   :  { %s2122_s0 = scalar_lea.hbm %s2620_s23, 16 }
 0xb80   :  { %p2123_p5 = scmp.ne.s32.totalorder %s2620_s23, %s2122_s0  ;;  %p2126_p6 = scmp.lt.u32.totalorder %s2122_s0, %s2620_s23 }
 0xb82   :  { %p2128_p7 = pnand %p2126_p6, %p2123_p5 }
 0xb84   :  { %2131 = shalt.err (!%p2128_p7)
}
 0xb85   :  { %1703 = dma.vmem_to_hbm [thread:$0]  %s1701_s18, 16, %s2620_s23, [#allocation3]  }
 0xb86   :  { %2132 = dma.done.wait [#allocation3], 16  }
 0xb87   :  { %2133 = vsyncadd [#allocation3], 4294967280 }
 0xb88   :  { %1709 = vsyncpa [#allocation3], 1 }

</bundles_post_ra>
